<compile_context>
chip_gen: v7x
topology: tpu7x:2x2x1
jax: 0.10.0
libtpu: 0.0.40
codegen_flags: <defaults>
</compile_context>

<pallas_src>
import math

import jax
import jax.numpy as jnp
import numpy as np
from jax.experimental import pallas as pl
from jax.experimental.pallas import tpu as pltpu

LN_EPS = 1e-5


def _silu(v):
    return v / (1.0 + jnp.exp(-v))


def _softplus(v):
    # matches F.softplus (threshold ~20)
    return jnp.where(v > 20.0, v, jnp.log1p(jnp.exp(jnp.minimum(v, 20.0))))


# ----------------------------------------------------------------------------
# Fused Block kernel: add + LayerNorm + mask + one Mamba direction per grid
# step; grid = (batch, direction).  All weights are pre-transposed so every
# matmul is (sequence on sublanes) @ (channels on lanes).
# ----------------------------------------------------------------------------
def block_kernel(h_ref, r_ref, m_ref, lnw_ref, lnb_ref,
                 inw_ref, convw_ref, convb_ref, xpw_ref,
                 dtw_ref, dtb_ref, a_ref, dpar_ref, outw_ref,
                 o_ref, res_ref,
                 xn_scr, pad_scr, dt_scr, xc_scr, bc_scr, y_scr, hbuf_scr):
    L = h_ref.shape[1]
    d_inner = dt_scr.shape[1]
    d_state = a_ref.shape[1]
    K = convw_ref.shape[1]
    R = dtw_ref.shape[1]
    CHUNK = hbuf_scr.shape[0]
    n_chunks = L // CHUNK

    d = pl.program_id(1)            # 0 = forward Mamba, 1 = reverse Mamba

    # ---- fused Add + LayerNorm + mask (only once per batch element) --------
    @pl.when(d == 0)
    def _():
        res = h_ref[0] + r_ref[0]                           # (L, D) f32
        res_ref[0] = res                                    # Block's residual output
        mu = jnp.mean(res, axis=-1, keepdims=True)
        var = jnp.mean((res - mu) ** 2, axis=-1, keepdims=True)
        xn = (res - mu) * jax.lax.rsqrt(var + LN_EPS)
        xn = xn * lnw_ref[...] + lnb_ref[...]
        xn_scr[...] = (xn * m_ref[0]).astype(jnp.bfloat16)  # masked LN output, cached

    xm = xn_scr[...]                                        # (L, D) bf16

    # ---- in_proj (channel flip of the reverse direction folded into weights)
    xz = jnp.dot(xm, inw_ref[0], preferred_element_type=jnp.float32)   # (L, 2*d_inner)
    xin = xz[:, :d_inner]
    z = xz[:, d_inner:]

    # ---- causal depthwise conv1d (kernel K, padding K-1, truncated to L) ----
    pad_scr[0:K - 1, :] = jnp.zeros((K - 1, d_inner), jnp.float32)
    pad_scr[K - 1:, :] = xin
    convw = convw_ref[0]                                    # (K, d_inner)
    acc = jnp.zeros((L, d_inner), jnp.float32)
    for k in range(K):                                      # K is small & static
        acc = acc + pad_scr[k:k + L, :] * convw[k:k + 1, :]
    xc = _silu(acc + convb_ref[0])                          # (L, d_inner) f32

    # ---- x_proj -> (dt_low_rank | B | C), dt_proj + softplus ----------------
    xdbl = jnp.dot(xc.astype(jnp.bfloat16), xpw_ref[0],
                   preferred_element_type=jnp.float32)      # (L, R + 2N)
    dt = jnp.dot(xdbl[:, :R], dtw_ref[0],
                 preferred_element_type=jnp.float32) + dtb_ref[0]
    dt = _softplus(dt)                                      # (L, d_inner)

    dt_scr[...] = dt
    xc_scr[...] = xc
    bc_scr[...] = xdbl[:, R:]                               # (L, 2N) = [B | C]

    A = a_ref[0]                                            # (N, d_inner), negative

    # ---- selective scan: h in registers, chunked discretization ------------
    def chunk_body(c, h):
        t0 = pl.multiple_of(c * CHUNK, CHUNK)
        dt_c = dt_scr[pl.ds(t0, CHUNK), :]                  # (C, d_inner)
        u_c = xc_scr[pl.ds(t0, CHUNK), :]                   # (C, d_inner)
        bc_c = bc_scr[pl.ds(t0, CHUNK), :]                  # (C, 2N)
        b_c = bc_c[:, :d_state]
        c_c = bc_c[:, d_state:]
        dA_c = jnp.exp(dt_c[:, None, :] * A[None, :, :])            # (C, N, d_inner)
        dBu_c = b_c[:, :, None] * (dt_c * u_c)[:, None, :]          # (C, N, d_inner)
        for i in range(CHUNK):                              # unrolled recurrence
            h = dA_c[i] * h + dBu_c[i]                      # (N, d_inner), in regs
            hbuf_scr[i] = h
        # y[t] = sum_n C[t, n] * h_t[n, :]  — one chunked VPU/XLU contraction
        y_c = jnp.sum(c_c[:, :, None] * hbuf_scr[...], axis=1)      # (C, d_inner)
        y_scr[pl.ds(t0, CHUNK), :] = y_c                    # sublane-aligned store
        return h

    h0 = jnp.zeros((d_state, d_inner), jnp.float32)
    jax.lax.fori_loop(0, n_chunks, chunk_body, h0)

    # ---- skip connection, gate, out_proj, accumulate the two directions ----
    y = y_scr[...] + xc_scr[...] * dpar_ref[0]
    y = y * _silu(z)
    out = jnp.dot(y.astype(jnp.bfloat16), outw_ref[...],
                  preferred_element_type=jnp.float32)       # (L, D)

    @pl.when(d == 0)
    def _():
        o_ref[0] = out

    @pl.when(d == 1)
    def _():
        o_ref[0] = o_ref[0] + out


# ----------------------------------------------------------------------------
# Wrapper
# ----------------------------------------------------------------------------
def _stack_dir_params(params):
    """Stack fwd/rev weights along a leading direction axis, fold the channel
    flip of the reverse direction into its in_proj weights, and cast the big
    projection weights to bf16."""
    in_wT = params['in_w'].T                                        # (D, 2*d_inner)
    f, r = params['fwd'], params['rev']

    def stk(fn):
        return jnp.stack([fn(f), fn(r)], axis=0)

    return dict(
        in_wT=jnp.stack([in_wT, jnp.flip(in_wT, axis=0)],
                        axis=0).astype(jnp.bfloat16),               # (2, D, 2*d_inner)
        conv_wT=stk(lambda p: p['conv_w'].T),                       # (2, K, d_inner)
        conv_b=stk(lambda p: p['conv_b'][None, :]),                 # (2, 1, d_inner)
        xproj_wT=stk(lambda p: p['xproj_w'].T).astype(jnp.bfloat16),  # (2, d_inner, R+2N)
        dt_wT=stk(lambda p: p['dt_w'].T),                           # (2, R, d_inner)
        dt_b=stk(lambda p: p['dt_b'][None, :]),                     # (2, 1, d_inner)
        A_T=stk(lambda p: (-jnp.exp(p['A_log'])).T),                # (2, N, d_inner)
        D=stk(lambda p: p['D'][None, :]),                           # (2, 1, d_inner)
        out_wT=params['out_w'].T.astype(jnp.bfloat16),              # (d_inner, D)
        ln_w=params['ln_w'][None, :],                               # (1, D)
        ln_b=params['ln_b'][None, :],                               # (1, D)
    )


def block_forward(hidden_states, residual, input_mask, params):
    B, L, D = hidden_states.shape
    if residual is None:
        residual = jnp.zeros_like(hidden_states)
    if input_mask is None:
        input_mask = jnp.ones((B, L, 1), hidden_states.dtype)

    kp = _stack_dir_params(params)
    d_state, d_inner = kp['A_T'].shape[1], kp['A_T'].shape[2]
    K = kp['conv_wT'].shape[1]

    CHUNK = 8
    while L % CHUNK:
        CHUNK //= 2

    def dir_spec(a):
        return pl.BlockSpec((1,) + a.shape[1:],
                            lambda b, d, nd=a.ndim: (d,) + (0,) * (nd - 1))

    def shared_spec(a):
        return pl.BlockSpec(a.shape, lambda b, d, nd=a.ndim: (0,) * nd)

    in_specs = [
        pl.BlockSpec((1, L, D), lambda b, d: (b, 0, 0)),    # hidden_states
        pl.BlockSpec((1, L, D), lambda b, d: (b, 0, 0)),    # residual
        pl.BlockSpec((1, L, 1), lambda b, d: (b, 0, 0)),    # input_mask
        shared_spec(kp['ln_w']), shared_spec(kp['ln_b']),
        dir_spec(kp['in_wT']), dir_spec(kp['conv_wT']), dir_spec(kp['conv_b']),
        dir_spec(kp['xproj_wT']), dir_spec(kp['dt_wT']), dir_spec(kp['dt_b']),
        dir_spec(kp['A_T']), dir_spec(kp['D']),
        shared_spec(kp['out_wT']),
    ]
    out_specs = [
        pl.BlockSpec((1, L, D), lambda b, d: (b, 0, 0)),    # mixer out (accumulated over d)
        pl.BlockSpec((1, L, D), lambda b, d: (b, 0, 0)),    # residual out
    ]
    scratch = [
        pltpu.VMEM((L, D), jnp.bfloat16),                   # masked LayerNorm output
        pltpu.VMEM((L + K - 1, d_inner), jnp.float32),      # padded conv input
        pltpu.VMEM((L, d_inner), jnp.float32),              # dt
        pltpu.VMEM((L, d_inner), jnp.float32),              # conv/silu output u
        pltpu.VMEM((L, 2 * d_state), jnp.float32),          # [B | C]
        pltpu.VMEM((L, d_inner), jnp.float32),              # scan output y
        pltpu.VMEM((CHUNK, d_state, d_inner), jnp.float32),  # per-chunk h history
    ]

    mix, res = pl.pallas_call(
        block_kernel,
        out_shape=(jax.ShapeDtypeStruct((B, L, D), jnp.float32),
                   jax.ShapeDtypeStruct((B, L, D), jnp.float32)),
        grid_spec=pltpu.PrefetchScalarGridSpec(
            num_scalar_prefetch=0,
            grid=(B, 2),                                    # (batch, direction)
            in_specs=in_specs,
            out_specs=out_specs,
            scratch_shapes=scratch),
        compiler_params=pltpu.CompilerParams(
            dimension_semantics=("parallel", "arbitrary")),
    )(hidden_states, residual, input_mask,
      kp['ln_w'], kp['ln_b'], kp['in_wT'], kp['conv_wT'], kp['conv_b'],
      kp['xproj_wT'], kp['dt_wT'], kp['dt_b'], kp['A_T'], kp['D'], kp['out_wT'])
    return mix, res


# ----------------------------------------------------------------------------
# Pure-JAX reference (f32 everywhere)
# ----------------------------------------------------------------------------
def _layer_norm_ref(x, w, b, eps=LN_EPS):
    mu = x.mean(-1, keepdims=True)
    var = ((x - mu) ** 2).mean(-1, keepdims=True)
    return (x - mu) * jax.lax.rsqrt(var + eps) * w + b


def mamba_ref(x, shared, p):
    B, L, D = x.shape
    d_inner = shared['in_w'].shape[0] // 2
    K = p['conv_w'].shape[1]
    R = p['dt_w'].shape[1]
    N = p['A_log'].shape[1]
    xz = jnp.einsum('bld,ed->ble', x, shared['in_w'])
    xin, z = xz[..., :d_inner], xz[..., d_inner:]
    xp = jnp.pad(xin, ((0, 0), (K - 1, 0), (0, 0)))
    acc = sum(xp[:, k:k + L, :] * p['conv_w'][:, k] for k in range(K)) + p['conv_b']
    xc = _silu(acc)
    xdbl = jnp.einsum('bld,ed->ble', xc, p['xproj_w'])
    dt_in, Bm, Cm = xdbl[..., :R], xdbl[..., R:R + N], xdbl[..., R + N:]
    dt = _softplus(jnp.einsum('blr,dr->bld', dt_in, p['dt_w']) + p['dt_b'])
    A = -jnp.exp(p['A_log'])

    def step(h, inp):
        dt_t, x_t, B_t, C_t = inp
        dA = jnp.exp(dt_t[:, :, None] * A[None])
        dBu = (dt_t * x_t)[:, :, None] * B_t[:, None, :]
        h = dA * h + dBu
        return h, jnp.einsum('bdn,bn->bd', h, C_t)

    h0 = jnp.zeros((B, d_inner, N), jnp.float32)
    _, ys = jax.lax.scan(step, h0, (jnp.moveaxis(dt, 1, 0), jnp.moveaxis(xc, 1, 0),
                                    jnp.moveaxis(Bm, 1, 0), jnp.moveaxis(Cm, 1, 0)))
    y = jnp.moveaxis(ys, 0, 1) + xc * p['D']
    y = y * _silu(z)
    return jnp.einsum('bld,ed->ble', y, shared['out_w'])


def bimamba_ref(x, mask, params):
    xm = x * mask
    return (mamba_ref(xm, params, params['fwd']) +
            mamba_ref(jnp.flip(xm, axis=-1), params, params['rev']))


def block_ref(hidden_states, residual, input_mask, params):
    res = hidden_states + residual if residual is not None else hidden_states
    xn = _layer_norm_ref(res, params['ln_w'], params['ln_b'])
    return bimamba_ref(xn, input_mask, params), res


# ----------------------------------------------------------------------------
# Deterministic synthetic parameters (shapes follow Mamba.__init__ + LayerNorm)
# ----------------------------------------------------------------------------
def init_params(key, d_model=32, d_state=16, d_conv=4, expand=2):
    d_inner = expand * d_model
    dt_rank = math.ceil(d_model / 16)
    keys = jax.random.split(key, 6)

    def nrm(k, shape, scale):
        return scale * jax.random.normal(k, shape, jnp.float32)

    params = {
        'in_w': nrm(keys[0], (2 * d_inner, d_model), 0.1),   # shared (bias=False)
        'out_w': nrm(keys[1], (d_model, d_inner), 0.1),      # shared (bias=False)
        'ln_w': 1.0 + nrm(keys[2], (d_model,), 0.1),
        'ln_b': nrm(keys[3], (d_model,), 0.05),
    }
    for i, name in enumerate(('fwd', 'rev')):
        sub = jax.random.split(keys[4 + i], 4)
        dt_vals = jnp.exp(jnp.linspace(jnp.log(0.001), jnp.log(0.1), d_inner))
        params[name] = {
            'conv_w': nrm(sub[0], (d_inner, d_conv), 0.3),    # depthwise conv weight
            'conv_b': nrm(sub[1], (d_inner,), 0.1),           # conv_bias=True
            'xproj_w': nrm(sub[2], (dt_rank + 2 * d_state, d_inner), 0.2),
            'dt_w': nrm(sub[3], (d_inner, dt_rank), 0.5),
            'dt_b': jnp.log(jnp.expm1(dt_vals)).astype(jnp.float32),  # inv. softplus
            'A_log': jnp.log(jnp.broadcast_to(
                jnp.arange(1, d_state + 1, dtype=jnp.float32), (d_inner, d_state))),
            'D': jnp.ones((d_inner,), jnp.float32),
        }
    return params


if __name__ == "__main__":
    key = jax.random.PRNGKey(0)
    B, L, d_model = 2, 8, 32
    kx, kr, km, kp = jax.random.split(key, 4)
    hidden = jax.random.normal(kx, (B, L, d_model), jnp.float32)
    residual = jax.random.normal(kr, (B, L, d_model), jnp.float32)
    input_mask = (jax.random.uniform(km, (B, L, 1)) > 0.2).astype(jnp.float32)
    params = init_params(kp, d_model=d_model)

    mix, res = block_forward(hidden, residual, input_mask, params)
    mix, res = jax.block_until_ready((mix, res))

    mix_ref, res_ref = block_ref(hidden, residual, input_mask, params)
    assert mix.shape == (B, L, d_model) and res.shape == (B, L, d_model)
    np.testing.assert_allclose(np.asarray(res), np.asarray(res_ref), rtol=1e-5, atol=1e-5)
    np.testing.assert_allclose(np.asarray(mix), np.asarray(mix_ref), rtol=5e-2, atol=2e-2)
    print("KERNEL_OK")
</pallas_src>

<mosaic_0001>
module attributes {stable_mosaic.version = 11 : i64} {
  func.func @block_kernel(%arg0: i32, %arg1: i32, %arg2: memref<1x8x32xf32, #tpu.memory_space<vmem>>, %arg3: memref<1x8x32xf32, #tpu.memory_space<vmem>>, %arg4: memref<1x8x1xf32, #tpu.memory_space<vmem>>, %arg5: memref<1x32xf32, #tpu.memory_space<vmem>>, %arg6: memref<1x32xf32, #tpu.memory_space<vmem>>, %arg7: memref<1x32x128xbf16, #tpu.memory_space<vmem>>, %arg8: memref<1x4x64xf32, #tpu.memory_space<vmem>>, %arg9: memref<1x1x64xf32, #tpu.memory_space<vmem>>, %arg10: memref<1x64x34xbf16, #tpu.memory_space<vmem>>, %arg11: memref<1x2x64xf32, #tpu.memory_space<vmem>>, %arg12: memref<1x1x64xf32, #tpu.memory_space<vmem>>, %arg13: memref<1x16x64xf32, #tpu.memory_space<vmem>>, %arg14: memref<1x1x64xf32, #tpu.memory_space<vmem>>, %arg15: memref<64x32xbf16, #tpu.memory_space<vmem>>, %arg16: memref<1x8x32xf32, #tpu.memory_space<vmem>>, %arg17: memref<1x8x32xf32, #tpu.memory_space<vmem>>, %arg18: memref<8x32xbf16, #tpu.memory_space<vmem>>, %arg19: memref<11x64xf32, #tpu.memory_space<vmem>>, %arg20: memref<8x64xf32, #tpu.memory_space<vmem>>, %arg21: memref<8x64xf32, #tpu.memory_space<vmem>>, %arg22: memref<8x32xf32, #tpu.memory_space<vmem>>, %arg23: memref<8x64xf32, #tpu.memory_space<vmem>>, %arg24: memref<8x16x64xf32, #tpu.memory_space<vmem>>) attributes {dimension_semantics = [#tpu.dimension_semantics<parallel>, #tpu.dimension_semantics<arbitrary>], iteration_bounds = array<i64: 2, 2>, scalar_prefetch = 0 : i64, scratch_operands = 7 : i64, tpu.core_type = #tpu.core_type<tc>, window_params = [{transform_indices = @transform_0, window_bounds = array<i64: 1, 8, 32>}, {transform_indices = @transform_1, window_bounds = array<i64: 1, 8, 32>}, {transform_indices = @transform_2, window_bounds = array<i64: 1, 8, 1>}, {pipeline_mode = #tpu.pipeline_mode<synchronous>, transform_indices = @transform_3, window_bounds = array<i64: 1, 32>}, {pipeline_mode = #tpu.pipeline_mode<synchronous>, transform_indices = @transform_4, window_bounds = array<i64: 1, 32>}, {transform_indices = @transform_5, window_bounds = array<i64: 1, 32, 128>}, {transform_indices = @transform_6, window_bounds = array<i64: 1, 4, 64>}, {transform_indices = @transform_7, window_bounds = array<i64: 1, 1, 64>}, {transform_indices = @transform_8, window_bounds = array<i64: 1, 64, 34>}, {transform_indices = @transform_9, window_bounds = array<i64: 1, 2, 64>}, {transform_indices = @transform_10, window_bounds = array<i64: 1, 1, 64>}, {transform_indices = @transform_11, window_bounds = array<i64: 1, 16, 64>}, {transform_indices = @transform_12, window_bounds = array<i64: 1, 1, 64>}, {pipeline_mode = #tpu.pipeline_mode<synchronous>, transform_indices = @transform_13, window_bounds = array<i64: 64, 32>}, {transform_indices = @transform_14, window_bounds = array<i64: 1, 8, 32>}, {transform_indices = @transform_15, window_bounds = array<i64: 1, 8, 32>}]} {
    %c0_i32 = arith.constant 0 : i32
    %0 = arith.cmpi eq, %arg1, %c0_i32 : i32
    %1 = arith.extui %0 : i1 to i32
    %c0_i32_0 = arith.constant 0 : i32
    %2 = arith.cmpi ne, %1, %c0_i32_0 : i32
    scf.if %2 {
      %c0_92 = arith.constant 0 : index
      %c0_93 = arith.constant 0 : index
      %c0_94 = arith.constant 0 : index
      %195 = vector.load %arg2[%c0_92, %c0_93, %c0_94] : memref<1x8x32xf32, #tpu.memory_space<vmem>>, vector<1x8x32xf32>
      %196 = vector.shape_cast %195 : vector<1x8x32xf32> to vector<8x32xf32>
      %c0_95 = arith.constant 0 : index
      %c0_96 = arith.constant 0 : index
      %c0_97 = arith.constant 0 : index
      %197 = vector.load %arg3[%c0_95, %c0_96, %c0_97] : memref<1x8x32xf32, #tpu.memory_space<vmem>>, vector<1x8x32xf32>
      %198 = vector.shape_cast %197 : vector<1x8x32xf32> to vector<8x32xf32>
      %199 = arith.addf %196, %198 : vector<8x32xf32>
      %c0_98 = arith.constant 0 : index
      %c0_99 = arith.constant 0 : index
      %c0_100 = arith.constant 0 : index
      %200 = vector.load %arg17[%c0_98, %c0_99, %c0_100] : memref<1x8x32xf32, #tpu.memory_space<vmem>>, vector<1x8x32xf32>
      %201 = vector.shape_cast %200 : vector<1x8x32xf32> to vector<8x32xf32>
      %202 = vector.shape_cast %199 : vector<8x32xf32> to vector<1x8x32xf32>
      tpu.vector_store %arg17[%c0_98, %c0_99, %c0_100], %202 {strides = array<i32>} : memref<1x8x32xf32, #tpu.memory_space<vmem>>, vector<1x8x32xf32>,
      %cst_101 = arith.constant dense<0.000000e+00> : vector<8xf32>
      %203 = vector.multi_reduction <add>, %199, %cst_101 [1] : vector<8x32xf32> to vector<8xf32>
      %204 = vector.shape_cast %203 : vector<8xf32> to vector<8x1xf32>
      %cst_102 = arith.constant 3.200000e+01 : f32
      %205 = vector.broadcast %cst_102 : f32 to vector<8x1xf32>
      %206 = arith.divf %204, %205 : vector<8x1xf32>
      %207 = vector.broadcast %206 : vector<8x1xf32> to vector<8x32xf32>
      %208 = arith.subf %199, %207 : vector<8x32xf32>
      %209 = arith.mulf %208, %208 : vector<8x32xf32>
      %cst_103 = arith.constant dense<0.000000e+00> : vector<8xf32>
      %210 = vector.multi_reduction <add>, %209, %cst_103 [1] : vector<8x32xf32> to vector<8xf32>
      %211 = vector.shape_cast %210 : vector<8xf32> to vector<8x1xf32>
      %cst_104 = arith.constant 3.200000e+01 : f32
      %212 = vector.broadcast %cst_104 : f32 to vector<8x1xf32>
      %213 = arith.divf %211, %212 : vector<8x1xf32>
      %214 = vector.broadcast %206 : vector<8x1xf32> to vector<8x32xf32>
      %215 = arith.subf %199, %214 : vector<8x32xf32>
      %cst_105 = arith.constant 9.99999974E-6 : f32
      %216 = vector.broadcast %cst_105 : f32 to vector<8x1xf32>
      %217 = arith.addf %213, %216 : vector<8x1xf32>
      %218 = math.rsqrt %217 : vector<8x1xf32>
      %219 = vector.broadcast %218 : vector<8x1xf32> to vector<8x32xf32>
      %220 = arith.mulf %215, %219 : vector<8x32xf32>
      %c0_106 = arith.constant 0 : index
      %c0_107 = arith.constant 0 : index
      %221 = vector.load %arg5[%c0_106, %c0_107] : memref<1x32xf32, #tpu.memory_space<vmem>>, vector<1x32xf32>
      %222 = vector.broadcast %221 : vector<1x32xf32> to vector<8x32xf32>
      %223 = arith.mulf %220, %222 : vector<8x32xf32>
      %c0_108 = arith.constant 0 : index
      %c0_109 = arith.constant 0 : index
      %224 = vector.load %arg6[%c0_108, %c0_109] : memref<1x32xf32, #tpu.memory_space<vmem>>, vector<1x32xf32>
      %225 = vector.broadcast %224 : vector<1x32xf32> to vector<8x32xf32>
      %226 = arith.addf %223, %225 : vector<8x32xf32>
      %c0_110 = arith.constant 0 : index
      %c0_111 = arith.constant 0 : index
      %c0_112 = arith.constant 0 : index
      %227 = vector.load %arg4[%c0_110, %c0_111, %c0_112] : memref<1x8x1xf32, #tpu.memory_space<vmem>>, vector<1x8x1xf32>
      %228 = vector.shape_cast %227 : vector<1x8x1xf32> to vector<8x1xf32>
      %229 = vector.broadcast %228 : vector<8x1xf32> to vector<8x32xf32>
      %230 = arith.mulf %226, %229 : vector<8x32xf32>
      %231 = arith.truncf %230 : vector<8x32xf32> to vector<8x32xbf16>
      %c0_113 = arith.constant 0 : index
      %c0_114 = arith.constant 0 : index
      %232 = vector.load %arg18[%c0_113, %c0_114] : memref<8x32xbf16, #tpu.memory_space<vmem>>, vector<8x32xbf16>
      tpu.vector_store %arg18[%c0_113, %c0_114], %231 {strides = array<i32>} : memref<8x32xbf16, #tpu.memory_space<vmem>>, vector<8x32xbf16>,
    } else {
    }
    %c0 = arith.constant 0 : index
    %c0_1 = arith.constant 0 : index
    %3 = vector.load %arg18[%c0, %c0_1] : memref<8x32xbf16, #tpu.memory_space<vmem>>, vector<8x32xbf16>
    %c0_2 = arith.constant 0 : index
    %c0_3 = arith.constant 0 : index
    %c0_4 = arith.constant 0 : index
    %4 = vector.load %arg7[%c0_2, %c0_3, %c0_4] : memref<1x32x128xbf16, #tpu.memory_space<vmem>>, vector<1x32x128xbf16>
    %5 = vector.shape_cast %4 : vector<1x32x128xbf16> to vector<32x128xbf16>
    %cst = arith.constant dense<0.000000e+00> : vector<8x128xf32>
    %6 = tpu.matmul %3, %5, %cst {dimension_numbers = #tpu.dot_dimension_numbers<[1], [0], [0], [1], [0, 0, 1, 1], [], []>} : vector<8x32xbf16>, vector<32x128xbf16>, vector<8x128xf32> -> vector<8x128xf32>
    %7 = vector.extract_strided_slice %6 {offsets = [0, 0], sizes = [8, 64], strides = [1, 1]} : vector<8x128xf32> to vector<8x64xf32>
    %8 = vector.extract_strided_slice %6 {offsets = [0, 64], sizes = [8, 64], strides = [1, 1]} : vector<8x128xf32> to vector<8x64xf32>
    %cst_5 = arith.constant 0.000000e+00 : f32
    %9 = vector.broadcast %cst_5 : f32 to vector<3x64xf32>
    %c0_6 = arith.constant 0 : index
    %c0_7 = arith.constant 0 : index
    %10 = vector.load %arg19[%c0_6, %c0_7] : memref<11x64xf32, #tpu.memory_space<vmem>>, vector<3x64xf32>
    tpu.vector_store %arg19[%c0_6, %c0_7], %9 {strides = array<i32>} : memref<11x64xf32, #tpu.memory_space<vmem>>, vector<3x64xf32>,
    %c3 = arith.constant 3 : index
    %c0_8 = arith.constant 0 : index
    %11 = vector.load %arg19[%c3, %c0_8] : memref<11x64xf32, #tpu.memory_space<vmem>>, vector<8x64xf32>
    tpu.vector_store %arg19[%c3, %c0_8], %7 {strides = array<i32>} : memref<11x64xf32, #tpu.memory_space<vmem>>, vector<8x64xf32>,
    %c0_9 = arith.constant 0 : index
    %c0_10 = arith.constant 0 : index
    %c0_11 = arith.constant 0 : index
    %12 = vector.load %arg8[%c0_9, %c0_10, %c0_11] : memref<1x4x64xf32, #tpu.memory_space<vmem>>, vector<1x4x64xf32>
    %13 = vector.shape_cast %12 : vector<1x4x64xf32> to vector<4x64xf32>
    %cst_12 = arith.constant 0.000000e+00 : f32
    %14 = vector.broadcast %cst_12 : f32 to vector<8x64xf32>
    %c0_13 = arith.constant 0 : index
    %c0_14 = arith.constant 0 : index
    %15 = vector.load %arg19[%c0_13, %c0_14] : memref<11x64xf32, #tpu.memory_space<vmem>>, vector<8x64xf32>
    %16 = vector.extract_strided_slice %13 {offsets = [0, 0], sizes = [1, 64], strides = [1, 1]} : vector<4x64xf32> to vector<1x64xf32>
    %17 = vector.broadcast %16 : vector<1x64xf32> to vector<8x64xf32>
    %18 = arith.mulf %15, %17 : vector<8x64xf32>
    %19 = arith.addf %14, %18 : vector<8x64xf32>
    %c1 = arith.constant 1 : index
    %c0_15 = arith.constant 0 : index
    %20 = vector.load %arg19[%c1, %c0_15] : memref<11x64xf32, #tpu.memory_space<vmem>>, vector<8x64xf32>
    %21 = vector.extract_strided_slice %13 {offsets = [1, 0], sizes = [1, 64], strides = [1, 1]} : vector<4x64xf32> to vector<1x64xf32>
    %22 = vector.broadcast %21 : vector<1x64xf32> to vector<8x64xf32>
    %23 = arith.mulf %20, %22 : vector<8x64xf32>
    %24 = arith.addf %19, %23 : vector<8x64xf32>
    %c2 = arith.constant 2 : index
    %c0_16 = arith.constant 0 : index
    %25 = vector.load %arg19[%c2, %c0_16] : memref<11x64xf32, #tpu.memory_space<vmem>>, vector<8x64xf32>
    %26 = vector.extract_strided_slice %13 {offsets = [2, 0], sizes = [1, 64], strides = [1, 1]} : vector<4x64xf32> to vector<1x64xf32>
    %27 = vector.broadcast %26 : vector<1x64xf32> to vector<8x64xf32>
    %28 = arith.mulf %25, %27 : vector<8x64xf32>
    %29 = arith.addf %24, %28 : vector<8x64xf32>
    %c3_17 = arith.constant 3 : index
    %c0_18 = arith.constant 0 : index
    %30 = vector.load %arg19[%c3_17, %c0_18] : memref<11x64xf32, #tpu.memory_space<vmem>>, vector<8x64xf32>
    %31 = vector.extract_strided_slice %13 {offsets = [3, 0], sizes = [1, 64], strides = [1, 1]} : vector<4x64xf32> to vector<1x64xf32>
    %32 = vector.broadcast %31 : vector<1x64xf32> to vector<8x64xf32>
    %33 = arith.mulf %30, %32 : vector<8x64xf32>
    %34 = arith.addf %29, %33 : vector<8x64xf32>
    %c0_19 = arith.constant 0 : index
    %c0_20 = arith.constant 0 : index
    %c0_21 = arith.constant 0 : index
    %35 = vector.load %arg9[%c0_19, %c0_20, %c0_21] : memref<1x1x64xf32, #tpu.memory_space<vmem>>, vector<1x1x64xf32>
    %36 = vector.shape_cast %35 : vector<1x1x64xf32> to vector<1x64xf32>
    %37 = vector.broadcast %36 : vector<1x64xf32> to vector<8x64xf32>
    %38 = arith.addf %34, %37 : vector<8x64xf32>
    %cst_22 = arith.constant 0.000000e+00 : f32
    %39 = vector.broadcast %cst_22 : f32 to vector<8x64xf32>
    %40 = arith.subf %39, %38 : vector<8x64xf32>
    %41 = math.exp %40 : vector<8x64xf32>
    %cst_23 = arith.constant 1.000000e+00 : f32
    %42 = vector.broadcast %cst_23 : f32 to vector<8x64xf32>
    %43 = arith.addf %42, %41 : vector<8x64xf32>
    %44 = arith.divf %38, %43 : vector<8x64xf32>
    %45 = arith.truncf %44 : vector<8x64xf32> to vector<8x64xbf16>
    %c0_24 = arith.constant 0 : index
    %c0_25 = arith.constant 0 : index
    %c0_26 = arith.constant 0 : index
    %46 = vector.load %arg10[%c0_24, %c0_25, %c0_26] : memref<1x64x34xbf16, #tpu.memory_space<vmem>>, vector<1x64x34xbf16>
    %47 = vector.shape_cast %46 : vector<1x64x34xbf16> to vector<64x34xbf16>
    %cst_27 = arith.constant dense<0.000000e+00> : vector<8x34xf32>
    %48 = tpu.matmul %45, %47, %cst_27 {dimension_numbers = #tpu.dot_dimension_numbers<[1], [0], [0], [1], [0, 0, 1, 1], [], []>} : vector<8x64xbf16>, vector<64x34xbf16>, vector<8x34xf32> -> vector<8x34xf32>
    %49 = vector.extract_strided_slice %48 {offsets = [0, 0], sizes = [8, 2], strides = [1, 1]} : vector<8x34xf32> to vector<8x2xf32>
    %c0_28 = arith.constant 0 : index
    %c0_29 = arith.constant 0 : index
    %c0_30 = arith.constant 0 : index
    %50 = vector.load %arg11[%c0_28, %c0_29, %c0_30] : memref<1x2x64xf32, #tpu.memory_space<vmem>>, vector<1x2x64xf32>
    %51 = vector.shape_cast %50 : vector<1x2x64xf32> to vector<2x64xf32>
    %cst_31 = arith.constant dense<0.000000e+00> : vector<8x64xf32>
    %52 = tpu.matmul %49, %51, %cst_31 {dimension_numbers = #tpu.dot_dimension_numbers<[1], [0], [0], [1], [0, 0, 1, 1], [], []>} : vector<8x2xf32>, vector<2x64xf32>, vector<8x64xf32> -> vector<8x64xf32>
    %c0_32 = arith.constant 0 : index
    %c0_33 = arith.constant 0 : index
    %c0_34 = arith.constant 0 : index
    %53 = vector.load %arg12[%c0_32, %c0_33, %c0_34] : memref<1x1x64xf32, #tpu.memory_space<vmem>>, vector<1x1x64xf32>
    %54 = vector.shape_cast %53 : vector<1x1x64xf32> to vector<1x64xf32>
    %55 = vector.broadcast %54 : vector<1x64xf32> to vector<8x64xf32>
    %56 = arith.addf %52, %55 : vector<8x64xf32>
    %cst_35 = arith.constant 2.000000e+01 : f32
    %57 = vector.broadcast %cst_35 : f32 to vector<8x64xf32>
    %58 = arith.cmpf ogt, %56, %57 : vector<8x64xf32>
    %cst_36 = arith.constant 2.000000e+01 : f32
    %59 = vector.broadcast %cst_36 : f32 to vector<8x64xf32>
    %60 = arith.minimumf %56, %59 : vector<8x64xf32>
    %61 = math.exp %60 : vector<8x64xf32>
    %62 = math.log1p %61 : vector<8x64xf32>
    %63 = arith.select %58, %56, %62 : vector<8x64xi1>, vector<8x64xf32>
    %c0_37 = arith.constant 0 : index
    %c0_38 = arith.constant 0 : index
    %64 = vector.load %arg20[%c0_37, %c0_38] : memref<8x64xf32, #tpu.memory_space<vmem>>, vector<8x64xf32>
    tpu.vector_store %arg20[%c0_37, %c0_38], %63 {strides = array<i32>} : memref<8x64xf32, #tpu.memory_space<vmem>>, vector<8x64xf32>,
    %c0_39 = arith.constant 0 : index
    %c0_40 = arith.constant 0 : index
    %65 = vector.load %arg21[%c0_39, %c0_40] : memref<8x64xf32, #tpu.memory_space<vmem>>, vector<8x64xf32>
    tpu.vector_store %arg21[%c0_39, %c0_40], %44 {strides = array<i32>} : memref<8x64xf32, #tpu.memory_space<vmem>>, vector<8x64xf32>,
    %66 = vector.extract_strided_slice %48 {offsets = [0, 2], sizes = [8, 32], strides = [1, 1]} : vector<8x34xf32> to vector<8x32xf32>
    %c0_41 = arith.constant 0 : index
    %c0_42 = arith.constant 0 : index
    %67 = vector.load %arg22[%c0_41, %c0_42] : memref<8x32xf32, #tpu.memory_space<vmem>>, vector<8x32xf32>
    tpu.vector_store %arg22[%c0_41, %c0_42], %66 {strides = array<i32>} : memref<8x32xf32, #tpu.memory_space<vmem>>, vector<8x32xf32>,
    %c0_43 = arith.constant 0 : index
    %c0_44 = arith.constant 0 : index
    %c0_45 = arith.constant 0 : index
    %68 = vector.load %arg13[%c0_43, %c0_44, %c0_45] : memref<1x16x64xf32, #tpu.memory_space<vmem>>, vector<1x16x64xf32>
    %69 = vector.shape_cast %68 : vector<1x16x64xf32> to vector<16x64xf32>
    %cst_46 = arith.constant 0.000000e+00 : f32
    %70 = vector.broadcast %cst_46 : f32 to vector<16x64xf32>
    %c0_i32_47 = arith.constant 0 : i32
    %c8_i32 = arith.constant 8 : i32
    %71 = arith.muli %c0_i32_47, %c8_i32 : i32
    %72 = tpu.assume_multiple %71, 8 : i32
    %73 = arith.index_cast %72 : i32 to index
    %c0_48 = arith.constant 0 : index
    %74 = vector.load %arg20[%73, %c0_48] : memref<8x64xf32, #tpu.memory_space<vmem>>, vector<8x64xf32>
    %75 = arith.index_cast %72 : i32 to index
    %c0_49 = arith.constant 0 : index
    %76 = vector.load %arg21[%75, %c0_49] : memref<8x64xf32, #tpu.memory_space<vmem>>, vector<8x64xf32>
    %77 = arith.index_cast %72 : i32 to index
    %c0_50 = arith.constant 0 : index
    %78 = vector.load %arg22[%77, %c0_50] : memref<8x32xf32, #tpu.memory_space<vmem>>, vector<8x32xf32>
    %79 = vector.extract_strided_slice %78 {offsets = [0, 0], sizes = [8, 16], strides = [1, 1]} : vector<8x32xf32> to vector<8x16xf32>
    %80 = vector.extract_strided_slice %78 {offsets = [0, 16], sizes = [8, 16], strides = [1, 1]} : vector<8x32xf32> to vector<8x16xf32>
    %81 = vector.shape_cast %74 : vector<8x64xf32> to vector<8x1x64xf32>
    %82 = vector.shape_cast %69 : vector<16x64xf32> to vector<1x16x64xf32>
    %83 = vector.broadcast %81 : vector<8x1x64xf32> to vector<8x16x64xf32>
    %84 = vector.broadcast %82 : vector<1x16x64xf32> to vector<8x16x64xf32>
    %85 = arith.mulf %83, %84 : vector<8x16x64xf32>
    %86 = math.exp %85 : vector<8x16x64xf32>
    %87 = vector.shape_cast %79 : vector<8x16xf32> to vector<8x16x1xf32>
    %88 = arith.mulf %74, %76 : vector<8x64xf32>
    %89 = vector.shape_cast %88 : vector<8x64xf32> to vector<8x1x64xf32>
    %90 = vector.broadcast %87 : vector<8x16x1xf32> to vector<8x16x64xf32>
    %91 = vector.broadcast %89 : vector<8x1x64xf32> to vector<8x16x64xf32>
    %92 = arith.mulf %90, %91 : vector<8x16x64xf32>
    %93 = vector.extract_strided_slice %86 {offsets = [0, 0, 0], sizes = [1, 16, 64], strides = [1, 1, 1]} : vector<8x16x64xf32> to vector<1x16x64xf32>
    %94 = vector.shape_cast %93 : vector<1x16x64xf32> to vector<16x64xf32>
    %95 = arith.mulf %94, %70 : vector<16x64xf32>
    %96 = vector.extract_strided_slice %92 {offsets = [0, 0, 0], sizes = [1, 16, 64], strides = [1, 1, 1]} : vector<8x16x64xf32> to vector<1x16x64xf32>
    %97 = vector.shape_cast %96 : vector<1x16x64xf32> to vector<16x64xf32>
    %98 = arith.addf %95, %97 : vector<16x64xf32>
    %c0_51 = arith.constant 0 : index
    %c0_52 = arith.constant 0 : index
    %c0_53 = arith.constant 0 : index
    %99 = vector.load %arg24[%c0_51, %c0_52, %c0_53] : memref<8x16x64xf32, #tpu.memory_space<vmem>>, vector<1x16x64xf32>
    %100 = vector.shape_cast %99 : vector<1x16x64xf32> to vector<16x64xf32>
    %101 = vector.shape_cast %98 : vector<16x64xf32> to vector<1x16x64xf32>
    tpu.vector_store %arg24[%c0_51, %c0_52, %c0_53], %101 {strides = array<i32>} : memref<8x16x64xf32, #tpu.memory_space<vmem>>, vector<1x16x64xf32>,
    %102 = vector.extract_strided_slice %86 {offsets = [1, 0, 0], sizes = [1, 16, 64], strides = [1, 1, 1]} : vector<8x16x64xf32> to vector<1x16x64xf32>
    %103 = vector.shape_cast %102 : vector<1x16x64xf32> to vector<16x64xf32>
    %104 = arith.mulf %103, %98 : vector<16x64xf32>
    %105 = vector.extract_strided_slice %92 {offsets = [1, 0, 0], sizes = [1, 16, 64], strides = [1, 1, 1]} : vector<8x16x64xf32> to vector<1x16x64xf32>
    %106 = vector.shape_cast %105 : vector<1x16x64xf32> to vector<16x64xf32>
    %107 = arith.addf %104, %106 : vector<16x64xf32>
    %c1_54 = arith.constant 1 : index
    %c0_55 = arith.constant 0 : index
    %c0_56 = arith.constant 0 : index
    %108 = vector.load %arg24[%c1_54, %c0_55, %c0_56] : memref<8x16x64xf32, #tpu.memory_space<vmem>>, vector<1x16x64xf32>
    %109 = vector.shape_cast %108 : vector<1x16x64xf32> to vector<16x64xf32>
    %110 = vector.shape_cast %107 : vector<16x64xf32> to vector<1x16x64xf32>
    tpu.vector_store %arg24[%c1_54, %c0_55, %c0_56], %110 {strides = array<i32>} : memref<8x16x64xf32, #tpu.memory_space<vmem>>, vector<1x16x64xf32>,
    %111 = vector.extract_strided_slice %86 {offsets = [2, 0, 0], sizes = [1, 16, 64], strides = [1, 1, 1]} : vector<8x16x64xf32> to vector<1x16x64xf32>
    %112 = vector.shape_cast %111 : vector<1x16x64xf32> to vector<16x64xf32>
    %113 = arith.mulf %112, %107 : vector<16x64xf32>
    %114 = vector.extract_strided_slice %92 {offsets = [2, 0, 0], sizes = [1, 16, 64], strides = [1, 1, 1]} : vector<8x16x64xf32> to vector<1x16x64xf32>
    %115 = vector.shape_cast %114 : vector<1x16x64xf32> to vector<16x64xf32>
    %116 = arith.addf %113, %115 : vector<16x64xf32>
    %c2_57 = arith.constant 2 : index
    %c0_58 = arith.constant 0 : index
    %c0_59 = arith.constant 0 : index
    %117 = vector.load %arg24[%c2_57, %c0_58, %c0_59] : memref<8x16x64xf32, #tpu.memory_space<vmem>>, vector<1x16x64xf32>
    %118 = vector.shape_cast %117 : vector<1x16x64xf32> to vector<16x64xf32>
    %119 = vector.shape_cast %116 : vector<16x64xf32> to vector<1x16x64xf32>
    tpu.vector_store %arg24[%c2_57, %c0_58, %c0_59], %119 {strides = array<i32>} : memref<8x16x64xf32, #tpu.memory_space<vmem>>, vector<1x16x64xf32>,
    %120 = vector.extract_strided_slice %86 {offsets = [3, 0, 0], sizes = [1, 16, 64], strides = [1, 1, 1]} : vector<8x16x64xf32> to vector<1x16x64xf32>
    %121 = vector.shape_cast %120 : vector<1x16x64xf32> to vector<16x64xf32>
    %122 = arith.mulf %121, %116 : vector<16x64xf32>
    %123 = vector.extract_strided_slice %92 {offsets = [3, 0, 0], sizes = [1, 16, 64], strides = [1, 1, 1]} : vector<8x16x64xf32> to vector<1x16x64xf32>
    %124 = vector.shape_cast %123 : vector<1x16x64xf32> to vector<16x64xf32>
    %125 = arith.addf %122, %124 : vector<16x64xf32>
    %c3_60 = arith.constant 3 : index
    %c0_61 = arith.constant 0 : index
    %c0_62 = arith.constant 0 : index
    %126 = vector.load %arg24[%c3_60, %c0_61, %c0_62] : memref<8x16x64xf32, #tpu.memory_space<vmem>>, vector<1x16x64xf32>
    %127 = vector.shape_cast %126 : vector<1x16x64xf32> to vector<16x64xf32>
    %128 = vector.shape_cast %125 : vector<16x64xf32> to vector<1x16x64xf32>
    tpu.vector_store %arg24[%c3_60, %c0_61, %c0_62], %128 {strides = array<i32>} : memref<8x16x64xf32, #tpu.memory_space<vmem>>, vector<1x16x64xf32>,
    %129 = vector.extract_strided_slice %86 {offsets = [4, 0, 0], sizes = [1, 16, 64], strides = [1, 1, 1]} : vector<8x16x64xf32> to vector<1x16x64xf32>
    %130 = vector.shape_cast %129 : vector<1x16x64xf32> to vector<16x64xf32>
    %131 = arith.mulf %130, %125 : vector<16x64xf32>
    %132 = vector.extract_strided_slice %92 {offsets = [4, 0, 0], sizes = [1, 16, 64], strides = [1, 1, 1]} : vector<8x16x64xf32> to vector<1x16x64xf32>
    %133 = vector.shape_cast %132 : vector<1x16x64xf32> to vector<16x64xf32>
    %134 = arith.addf %131, %133 : vector<16x64xf32>
    %c4 = arith.constant 4 : index
    %c0_63 = arith.constant 0 : index
    %c0_64 = arith.constant 0 : index
    %135 = vector.load %arg24[%c4, %c0_63, %c0_64] : memref<8x16x64xf32, #tpu.memory_space<vmem>>, vector<1x16x64xf32>
    %136 = vector.shape_cast %135 : vector<1x16x64xf32> to vector<16x64xf32>
    %137 = vector.shape_cast %134 : vector<16x64xf32> to vector<1x16x64xf32>
    tpu.vector_store %arg24[%c4, %c0_63, %c0_64], %137 {strides = array<i32>} : memref<8x16x64xf32, #tpu.memory_space<vmem>>, vector<1x16x64xf32>,
    %138 = vector.extract_strided_slice %86 {offsets = [5, 0, 0], sizes = [1, 16, 64], strides = [1, 1, 1]} : vector<8x16x64xf32> to vector<1x16x64xf32>
    %139 = vector.shape_cast %138 : vector<1x16x64xf32> to vector<16x64xf32>
    %140 = arith.mulf %139, %134 : vector<16x64xf32>
    %141 = vector.extract_strided_slice %92 {offsets = [5, 0, 0], sizes = [1, 16, 64], strides = [1, 1, 1]} : vector<8x16x64xf32> to vector<1x16x64xf32>
    %142 = vector.shape_cast %141 : vector<1x16x64xf32> to vector<16x64xf32>
    %143 = arith.addf %140, %142 : vector<16x64xf32>
    %c5 = arith.constant 5 : index
    %c0_65 = arith.constant 0 : index
    %c0_66 = arith.constant 0 : index
    %144 = vector.load %arg24[%c5, %c0_65, %c0_66] : memref<8x16x64xf32, #tpu.memory_space<vmem>>, vector<1x16x64xf32>
    %145 = vector.shape_cast %144 : vector<1x16x64xf32> to vector<16x64xf32>
    %146 = vector.shape_cast %143 : vector<16x64xf32> to vector<1x16x64xf32>
    tpu.vector_store %arg24[%c5, %c0_65, %c0_66], %146 {strides = array<i32>} : memref<8x16x64xf32, #tpu.memory_space<vmem>>, vector<1x16x64xf32>,
    %147 = vector.extract_strided_slice %86 {offsets = [6, 0, 0], sizes = [1, 16, 64], strides = [1, 1, 1]} : vector<8x16x64xf32> to vector<1x16x64xf32>
    %148 = vector.shape_cast %147 : vector<1x16x64xf32> to vector<16x64xf32>
    %149 = arith.mulf %148, %143 : vector<16x64xf32>
    %150 = vector.extract_strided_slice %92 {offsets = [6, 0, 0], sizes = [1, 16, 64], strides = [1, 1, 1]} : vector<8x16x64xf32> to vector<1x16x64xf32>
    %151 = vector.shape_cast %150 : vector<1x16x64xf32> to vector<16x64xf32>
    %152 = arith.addf %149, %151 : vector<16x64xf32>
    %c6 = arith.constant 6 : index
    %c0_67 = arith.constant 0 : index
    %c0_68 = arith.constant 0 : index
    %153 = vector.load %arg24[%c6, %c0_67, %c0_68] : memref<8x16x64xf32, #tpu.memory_space<vmem>>, vector<1x16x64xf32>
    %154 = vector.shape_cast %153 : vector<1x16x64xf32> to vector<16x64xf32>
    %155 = vector.shape_cast %152 : vector<16x64xf32> to vector<1x16x64xf32>
    tpu.vector_store %arg24[%c6, %c0_67, %c0_68], %155 {strides = array<i32>} : memref<8x16x64xf32, #tpu.memory_space<vmem>>, vector<1x16x64xf32>,
    %156 = vector.extract_strided_slice %86 {offsets = [7, 0, 0], sizes = [1, 16, 64], strides = [1, 1, 1]} : vector<8x16x64xf32> to vector<1x16x64xf32>
    %157 = vector.shape_cast %156 : vector<1x16x64xf32> to vector<16x64xf32>
    %158 = arith.mulf %157, %152 : vector<16x64xf32>
    %159 = vector.extract_strided_slice %92 {offsets = [7, 0, 0], sizes = [1, 16, 64], strides = [1, 1, 1]} : vector<8x16x64xf32> to vector<1x16x64xf32>
    %160 = vector.shape_cast %159 : vector<1x16x64xf32> to vector<16x64xf32>
    %161 = arith.addf %158, %160 : vector<16x64xf32>
    %c7 = arith.constant 7 : index
    %c0_69 = arith.constant 0 : index
    %c0_70 = arith.constant 0 : index
    %162 = vector.load %arg24[%c7, %c0_69, %c0_70] : memref<8x16x64xf32, #tpu.memory_space<vmem>>, vector<1x16x64xf32>
    %163 = vector.shape_cast %162 : vector<1x16x64xf32> to vector<16x64xf32>
    %164 = vector.shape_cast %161 : vector<16x64xf32> to vector<1x16x64xf32>
    tpu.vector_store %arg24[%c7, %c0_69, %c0_70], %164 {strides = array<i32>} : memref<8x16x64xf32, #tpu.memory_space<vmem>>, vector<1x16x64xf32>,
    %165 = vector.shape_cast %80 : vector<8x16xf32> to vector<8x16x1xf32>
    %c0_71 = arith.constant 0 : index
    %c0_72 = arith.constant 0 : index
    %c0_73 = arith.constant 0 : index
    %166 = vector.load %arg24[%c0_71, %c0_72, %c0_73] : memref<8x16x64xf32, #tpu.memory_space<vmem>>, vector<8x16x64xf32>
    %167 = vector.broadcast %165 : vector<8x16x1xf32> to vector<8x16x64xf32>
    %168 = arith.mulf %167, %166 : vector<8x16x64xf32>
    %cst_74 = arith.constant dense<0.000000e+00> : vector<8x64xf32>
    %169 = vector.multi_reduction <add>, %168, %cst_74 [1] : vector<8x16x64xf32> to vector<8x64xf32>
    %170 = arith.index_cast %72 : i32 to index
    %c0_75 = arith.constant 0 : index
    %171 = vector.load %arg23[%170, %c0_75] : memref<8x64xf32, #tpu.memory_space<vmem>>, vector<8x64xf32>
    tpu.vector_store %arg23[%170, %c0_75], %169 {strides = array<i32>} : memref<8x64xf32, #tpu.memory_space<vmem>>, vector<8x64xf32>,
    %c1_i32 = arith.constant 1 : i32
    %c0_76 = arith.constant 0 : index
    %c0_77 = arith.constant 0 : index
    %172 = vector.load %arg23[%c0_76, %c0_77] : memref<8x64xf32, #tpu.memory_space<vmem>>, vector<8x64xf32>
    %c0_78 = arith.constant 0 : index
    %c0_79 = arith.constant 0 : index
    %173 = vector.load %arg21[%c0_78, %c0_79] : memref<8x64xf32, #tpu.memory_space<vmem>>, vector<8x64xf32>
    %c0_80 = arith.constant 0 : index
    %c0_81 = arith.constant 0 : index
    %c0_82 = arith.constant 0 : index
    %174 = vector.load %arg14[%c0_80, %c0_81, %c0_82] : memref<1x1x64xf32, #tpu.memory_space<vmem>>, vector<1x1x64xf32>
    %175 = vector.shape_cast %174 : vector<1x1x64xf32> to vector<1x64xf32>
    %176 = vector.broadcast %175 : vector<1x64xf32> to vector<8x64xf32>
    %177 = arith.mulf %173, %176 : vector<8x64xf32>
    %178 = arith.addf %172, %177 : vector<8x64xf32>
    %cst_83 = arith.constant 0.000000e+00 : f32
    %179 = vector.broadcast %cst_83 : f32 to vector<8x64xf32>
    %180 = arith.subf %179, %8 : vector<8x64xf32>
    %181 = math.exp %180 : vector<8x64xf32>
    %cst_84 = arith.constant 1.000000e+00 : f32
    %182 = vector.broadcast %cst_84 : f32 to vector<8x64xf32>
    %183 = arith.addf %182, %181 : vector<8x64xf32>
    %184 = arith.divf %8, %183 : vector<8x64xf32>
    %185 = arith.mulf %178, %184 : vector<8x64xf32>
    %186 = arith.truncf %185 : vector<8x64xf32> to vector<8x64xbf16>
    %c0_85 = arith.constant 0 : index
    %c0_86 = arith.constant 0 : index
    %187 = vector.load %arg15[%c0_85, %c0_86] : memref<64x32xbf16, #tpu.memory_space<vmem>>, vector<64x32xbf16>
    %cst_87 = arith.constant dense<0.000000e+00> : vector<8x32xf32>
    %188 = tpu.matmul %186, %187, %cst_87 {dimension_numbers = #tpu.dot_dimension_numbers<[1], [0], [0], [1], [0, 0, 1, 1], [], []>} : vector<8x64xbf16>, vector<64x32xbf16>, vector<8x32xf32> -> vector<8x32xf32>
    %c0_i32_88 = arith.constant 0 : i32
    %189 = arith.cmpi eq, %arg1, %c0_i32_88 : i32
    %190 = arith.extui %189 : i1 to i32
    %c0_i32_89 = arith.constant 0 : i32
    %191 = arith.cmpi ne, %190, %c0_i32_89 : i32
    scf.if %191 {
      %c0_92 = arith.constant 0 : index
      %c0_93 = arith.constant 0 : index
      %c0_94 = arith.constant 0 : index
      %195 = vector.load %arg16[%c0_92, %c0_93, %c0_94] : memref<1x8x32xf32, #tpu.memory_space<vmem>>, vector<1x8x32xf32>
      %196 = vector.shape_cast %195 : vector<1x8x32xf32> to vector<8x32xf32>
      %197 = vector.shape_cast %188 : vector<8x32xf32> to vector<1x8x32xf32>
      tpu.vector_store %arg16[%c0_92, %c0_93, %c0_94], %197 {strides = array<i32>} : memref<1x8x32xf32, #tpu.memory_space<vmem>>, vector<1x8x32xf32>,
    } else {
    }
    %c1_i32_90 = arith.constant 1 : i32
    %192 = arith.cmpi eq, %arg1, %c1_i32_90 : i32
    %193 = arith.extui %192 : i1 to i32
    %c0_i32_91 = arith.constant 0 : i32
    %194 = arith.cmpi ne, %193, %c0_i32_91 : i32
    scf.if %194 {
      %c0_92 = arith.constant 0 : index
      %c0_93 = arith.constant 0 : index
      %c0_94 = arith.constant 0 : index
      %195 = vector.load %arg16[%c0_92, %c0_93, %c0_94] : memref<1x8x32xf32, #tpu.memory_space<vmem>>, vector<1x8x32xf32>
      %196 = vector.shape_cast %195 : vector<1x8x32xf32> to vector<8x32xf32>
      %197 = arith.addf %196, %188 : vector<8x32xf32>
      %c0_95 = arith.constant 0 : index
      %c0_96 = arith.constant 0 : index
      %c0_97 = arith.constant 0 : index
      %198 = vector.load %arg16[%c0_95, %c0_96, %c0_97] : memref<1x8x32xf32, #tpu.memory_space<vmem>>, vector<1x8x32xf32>
      %199 = vector.shape_cast %198 : vector<1x8x32xf32> to vector<8x32xf32>
      %200 = vector.shape_cast %197 : vector<8x32xf32> to vector<1x8x32xf32>
      tpu.vector_store %arg16[%c0_95, %c0_96, %c0_97], %200 {strides = array<i32>} : memref<1x8x32xf32, #tpu.memory_space<vmem>>, vector<1x8x32xf32>,
    } else {
    }
    return
  }
  func.func @transform_0(%arg0: i32, %arg1: i32) -> (i32, i32, i32) {
    %c0_i32 = arith.constant 0 : i32
    %c0_i32_0 = arith.constant 0 : i32
    %c0_i32_1 = arith.constant 0 : i32
    return %arg0, %c0_i32, %c0_i32_0 : i32, i32, i32
  }
  func.func @transform_1(%arg0: i32, %arg1: i32) -> (i32, i32, i32) {
    %c0_i32 = arith.constant 0 : i32
    %c0_i32_0 = arith.constant 0 : i32
    %c0_i32_1 = arith.constant 0 : i32
    return %arg0, %c0_i32, %c0_i32_0 : i32, i32, i32
  }
  func.func @transform_2(%arg0: i32, %arg1: i32) -> (i32, i32, i32) {
    %c0_i32 = arith.constant 0 : i32
    %c0_i32_0 = arith.constant 0 : i32
    %c0_i32_1 = arith.constant 0 : i32
    return %arg0, %c0_i32, %c0_i32_0 : i32, i32, i32
  }
  func.func @transform_3(%arg0: i32, %arg1: i32) -> (i32, i32) {
    %c0_i32 = arith.constant 0 : i32
    %c0_i32_0 = arith.constant 0 : i32
    %c0_i32_1 = arith.constant 0 : i32
    return %c0_i32, %c0_i32_0 : i32, i32
  }
  func.func @transform_4(%arg0: i32, %arg1: i32) -> (i32, i32) {
    %c0_i32 = arith.constant 0 : i32
    %c0_i32_0 = arith.constant 0 : i32
    %c0_i32_1 = arith.constant 0 : i32
    return %c0_i32, %c0_i32_0 : i32, i32
  }
  func.func @transform_5(%arg0: i32, %arg1: i32) -> (i32, i32, i32) {
    %c0_i32 = arith.constant 0 : i32
    %c0_i32_0 = arith.constant 0 : i32
    %c0_i32_1 = arith.constant 0 : i32
    return %arg1, %c0_i32, %c0_i32_0 : i32, i32, i32
  }
  func.func @transform_6(%arg0: i32, %arg1: i32) -> (i32, i32, i32) {
    %c0_i32 = arith.constant 0 : i32
    %c0_i32_0 = arith.constant 0 : i32
    %c0_i32_1 = arith.constant 0 : i32
    return %arg1, %c0_i32, %c0_i32_0 : i32, i32, i32
  }
  func.func @transform_7(%arg0: i32, %arg1: i32) -> (i32, i32, i32) {
    %c0_i32 = arith.constant 0 : i32
    %c0_i32_0 = arith.constant 0 : i32
    %c0_i32_1 = arith.constant 0 : i32
    return %arg1, %c0_i32, %c0_i32_0 : i32, i32, i32
  }
  func.func @transform_8(%arg0: i32, %arg1: i32) -> (i32, i32, i32) {
    %c0_i32 = arith.constant 0 : i32
    %c0_i32_0 = arith.constant 0 : i32
    %c0_i32_1 = arith.constant 0 : i32
    return %arg1, %c0_i32, %c0_i32_0 : i32, i32, i32
  }
  func.func @transform_9(%arg0: i32, %arg1: i32) -> (i32, i32, i32) {
    %c0_i32 = arith.constant 0 : i32
    %c0_i32_0 = arith.constant 0 : i32
    %c0_i32_1 = arith.constant 0 : i32
    return %arg1, %c0_i32, %c0_i32_0 : i32, i32, i32
  }
  func.func @transform_10(%arg0: i32, %arg1: i32) -> (i32, i32, i32) {
    %c0_i32 = arith.constant 0 : i32
    %c0_i32_0 = arith.constant 0 : i32
    %c0_i32_1 = arith.constant 0 : i32
    return %arg1, %c0_i32, %c0_i32_0 : i32, i32, i32
  }
  func.func @transform_11(%arg0: i32, %arg1: i32) -> (i32, i32, i32) {
    %c0_i32 = arith.constant 0 : i32
    %c0_i32_0 = arith.constant 0 : i32
    %c0_i32_1 = arith.constant 0 : i32
    return %arg1, %c0_i32, %c0_i32_0 : i32, i32, i32
  }
  func.func @transform_12(%arg0: i32, %arg1: i32) -> (i32, i32, i32) {
    %c0_i32 = arith.constant 0 : i32
    %c0_i32_0 = arith.constant 0 : i32
    %c0_i32_1 = arith.constant 0 : i32
    return %arg1, %c0_i32, %c0_i32_0 : i32, i32, i32
  }
  func.func @transform_13(%arg0: i32, %arg1: i32) -> (i32, i32) {
    %c0_i32 = arith.constant 0 : i32
    %c0_i32_0 = arith.constant 0 : i32
    %c0_i32_1 = arith.constant 0 : i32
    return %c0_i32, %c0_i32_0 : i32, i32
  }
  func.func @transform_14(%arg0: i32, %arg1: i32) -> (i32, i32, i32) {
    %c0_i32 = arith.constant 0 : i32
    %c0_i32_0 = arith.constant 0 : i32
    %c0_i32_1 = arith.constant 0 : i32
    return %arg0, %c0_i32, %c0_i32_0 : i32, i32, i32
  }
  func.func @transform_15(%arg0: i32, %arg1: i32) -> (i32, i32, i32) {
    %c0_i32 = arith.constant 0 : i32
    %c0_i32_0 = arith.constant 0 : i32
    %c0_i32_1 = arith.constant 0 : i32
    return %arg0, %c0_i32, %c0_i32_0 : i32, i32, i32
  }
}

</mosaic_0001>

<bundles_post_ra>
// kernel: tpu_custom_call.1
= control target key start
LH: loop header
LB: loop body
LE: loop exit
PB: predicated region body
PF: predicated region fallthrough
CT: control target
= control target key end

     0   :  { %s2893_s0 = inlined_call_operand.vmem [shape: f32[2,8,32], index: 0, kind: input, shape index: {}]   ;;  %s2894_s1 = inlined_call_operand.vmem [shape: f32[2,8,32], index: 1, kind: input, shape index: {}]   ;;  %s2895_s2 = inlined_call_operand.vmem [shape: f32[2,8,1], index: 2, kind: input, shape index: {}]   ;;  %s2896_s3 = inlined_call_operand.vmem [shape: f32[1,32], index: 3, kind: input, shape index: {}]   ;;  %s2897_s4 = inlined_call_operand.vmem [shape: f32[1,32], index: 4, kind: input, shape index: {}]   ;;  %s2898_s5 = inlined_call_operand.vmem [shape: bf16[2,32,128], index: 5, kind: input, shape index: {}]   ;;  %s2899_s6 = inlined_call_operand.vmem [shape: f32[2,4,64], index: 6, kind: input, shape index: {}]   ;;  %s2900_s7 = inlined_call_operand.vmem [shape: f32[2,1,64], index: 7, kind: input, shape index: {}]   ;;  %s2901_s8 = inlined_call_operand.vmem [shape: bf16[2,64,34], index: 8, kind: input, shape index: {}]   ;;  %s2902_s9 = inlined_call_operand.vmem [shape: f32[2,2,64], index: 9, kind: input, shape index: {}]   ;;  %s2903_s10 = inlined_call_operand.vmem [shape: f32[2,1,64], index: 10, kind: input, shape index: {}]   ;;  %s2904_s11 = inlined_call_operand.vmem [shape: f32[2,16,64], index: 11, kind: input, shape index: {}]   ;;  %s2905_s12 = inlined_call_operand.vmem [shape: f32[2,1,64], index: 12, kind: input, shape index: {}]   ;;  %s2906_s13 = inlined_call_operand.vmem [shape: bf16[64,32], index: 13, kind: input, shape index: {}]   ;;  %s2907_s14 = inlined_call_operand.hbm [shape: f32[2,8,32], index: 14, kind: output, shape index: {0}]   ;;  %s2908_s15 = inlined_call_operand.hbm [shape: f32[2,8,32], index: 15, kind: output, shape index: {1}]  }
   0x1   :  { %2927 = sst [smem:[#allocation28_spill]] %s2893_s0 }
   0x2   :  { %2928 = sst [smem:[#allocation29_spill]] %s2894_s1 }
   0x3   :  { %2929 = sst [smem:[#allocation30_spill]] %s2895_s2 }
   0x4   :  { %2930 = sst [smem:[#allocation31_spill]] %s2896_s3 }
   0x5   :  { %2931 = sst [smem:[#allocation32_spill]] %s2897_s4 }
   0x6   :  { %2932 = sst [smem:[#allocation33_spill]] %s2898_s5 }
   0x7   :  { %2933 = sst [smem:[#allocation34_spill]] %s2899_s6 }
   0x8   :  { %2934 = sst [smem:[#allocation35_spill]] %s2906_s13 }
   0x9   :  { %2935 = sst [smem:[#allocation36_spill]] %s2907_s14 }
   0xa   :  { %2936 = sst [smem:[#allocation37_spill]] %s2908_s15 }
   0xb   :  { %21 = vsyncpa [#allocation10], 0 }
   0xc   :  { %23 = vsyncpa [#allocation10 + $0x1], 0 }
   0xd   :  { %24 = vsyncpa [#allocation12], 0 }
   0xe   :  { %26 = vsyncpa [#allocation12 + $0x1], 0  ;;  %s2420_s18 = smov 0   ;;  %s2422_s19 = smov 0  }
   0xf   :  { %s2424_s20 = smov 0   ;;  %s2426_s21 = smov 0  }
  0x10   :  { %s2428_s22 = smov 0   ;;  %s2430_s23 = smov 0  }
  0x11   :  { %s2432_s24 = smov 0   ;;  %s2434_s25 = smov 0  }
  0x12 LB: > { %2937 = sst [smem:[#allocation15_spill]] %s2302_s18  ;;  %s1962_s26 = sadd.s32 4294967295, %s2330_s25   ;;  %s2330_s25 = sphi %s2434_s25, %s32_s25   ;;  %s2326_s24 = sphi %s2432_s24, %s2975_s24   ;;  %s2322_s23 = sphi %s2430_s23, %s2974_s23   ;;  %s2318_s22 = sphi %s2428_s22, %s2973_s22   ;;  %s2314_s21 = sphi %s2426_s21, %s2972_s21   ;;  %s2310_s20 = sphi %s2424_s20, %s2971_s20   ;;  %s2306_s19 = sphi %s2422_s19, %s2970_s19   ;;  %s2302_s18 = sphi %s2420_s18, %s2969_s18  }
  0x13   : > { %2938 = sst [smem:[#allocation16_spill]] %s2306_s19  ;;  %s1963_s27 = sadd.s32 4294967294, %s2330_s25  }
  0x14   : > { %2939 = sst [smem:[#allocation17_spill]] %s2310_s20  ;;  %s41_s28 = sadd.s32 1, %s2322_s23 }
  0x15   : > { %2940 = sst [smem:[#allocation18_spill]] %s2318_s22  ;;  %p42_p0 = scmp.ge.s32.totalorder %s41_s28, 2 }
  0x16   : > { %2941 = sst [smem:[#allocation19_spill]] %s2322_s23  ;;  %s44_s29 = sadd.s32 1, %s2326_s24 }
  0x17   : > { %2942 = sst [smem:[#allocation20_spill]] %s2326_s24  ;;  %p410_p1 = scmp.ne.s32.totalorder %s2310_s20, %s2306_s19 }
  0x18   : > { %2943 = sst [smem:[#allocation21_spill]] %s2330_s25  ;;  %p411_p2 = scmp.eq.s32.totalorder %s1962_s26, 3 }
  0x19   : > { %s2977_s28 = smov (%p42_p0, %s41_s28), 0  ;;  %s2979_s29 = smov (!%p42_p0, %s44_s29), %s2326_s24 }
  0x1a   : > { %2944 = sst [smem:[#allocation22_spill]] %s2977_s28  ;;  %p2469_p3 = por %p411_p2, %p410_p1 }
  0x1b   : > { %p416_p4 = scmp.ne.s32.totalorder %s2306_s19, %s2302_s18  ;;  %p46_p5 = scmp.ge.s32.totalorder %s2979_s29, 2 }
  0x1c   : > { %s2945_s30 = scalar_select %p2469_p3, 1, 0 }
  0x1d   : > { %p417_p6 = scmp.eq.s32.totalorder %s1963_s27, 3  ;;  %p1966_p7 = scmp.ge.s32.totalorder %s2330_s25, 1 }
  0x1e   : > { %2946 = sst [smem:[#allocation23_spill]] %s2945_s30  ;;  %p547_p8 = scmp.lt.s32.totalorder %s2330_s25, 5 }
  0x1f   : > { %s2981_s29 = smov (%p46_p5, %s2979_s29), 0  ;;  %p2479_p9 = por %p417_p6, %p416_p4 }
  0x20   : > { %2947 = sst [smem:[#allocation24_spill]] %s2981_s29  ;;  %p548_p10 = pnand %p1966_p7, %p547_p8 }
  0x21   : > { %s2948_s16 = scalar_select %p2479_p9, 1, 0 }
  0x22   : > { %s397_s17 = ssub.s32 %s2326_s24, %s2981_s29  ;;  %s400_s26 = sadd.s32 1, %s2310_s20 }
  0x23   : > { %2949 = sst [smem:[#allocation25_spill]] %s2948_s16  ;;  %p398_p11 = scmp.eq.s32.totalorder %s397_s17, 0 }
  0x24   : > { %551 = sbr.rel (%p548_p10) target bundleno = 1486 (0x5ce), region = 76 }
  0x25   : > { %s2487_s28 = scalar_select %p398_p11, %s2310_s20, %s400_s26  }
  0x27   : > { %2950 = sst [smem:[#allocation26_spill]] %s2487_s28 }
  0x2b   : > { %s2490_s27 = sand.u32 1, %s2306_s19   ;;  %p639_p12 = scmp.lt.s32.totalorder %s2318_s22, 1 }
  0x2c   : > { %2951 = sst [smem:[#allocation27_spill]] %s2490_s27  ;;  %s1967_s23 = sshll.u32 %s2490_s27, 3 }
  0x2d   : > { %p651_p13 = scmp.lt.s32.totalorder %s2314_s21, 1  ;;  %s2952_s0 = sld [smem:[#allocation28_spill]] }
  0x2e   : > { %s640_s18 = scalar_select %p639_p12, %s2318_s22, 1 }
  0x2f   : > { %s2497_s16 = scalar_select %p651_p13, %s2314_s21, 1 }
  0x30   : > { %s1969_s17 = sshll.u32 %s640_s18, 3  ;;  %s2953_s1 = sld [smem:[#allocation29_spill]] }
  0x31   : > { %s2954_s2 = sld [smem:[#allocation30_spill]]  ;;  %s2009_s30 = sshll.u32 %s2497_s16, 4 }
  0x32   : > { %s2955_s5 = sld [smem:[#allocation33_spill]]  ;;  %s1974_s4 = sshll.u32 %s2497_s16, 2 }
  0x33   : > { %s642_s24 = scalar_lea.vmem %s2952_s0, %s1969_s17  ;;  %s2956_s6 = sld [smem:[#allocation34_spill]] }
  0x34   : > { %s2010_s28 = sshll.u32 %s2497_s16, 5  ;;  %s2543_s0 = scalar_lea.vmem %s2904_s11, %s2009_s30 }
  0x35   : > { %s682_s15 = scalar_lea.vmem %s2905_s12, %s2497_s16  ;;  %s2551_s25 = scalar_lea.vmem [#allocation11], %s1967_s23 }
  0x36   : > { %s646_s19 = scalar_lea.vmem %s2953_s1, %s1969_s17  ;;  %s1977_s1 = sshll.u32 %s2497_s16, 1 }
  0x37   : > { %s650_s14 = scalar_lea.vmem %s2954_s2, %s1969_s17  ;;  %s2529_s17 = scalar_lea.vmem %s2901_s8, %s2010_s28 }
  0x38   : > { %s2512_s13 = scalar_lea.vmem %s2955_s5, %s2009_s30  ;;  %s2534_s2 = scalar_lea.vmem %s2902_s9, %s1977_s1 }
  0x39   : > { %s2518_s29 = scalar_lea.vmem %s2956_s6, %s1974_s4  ;;  %s674_s4 = scalar_lea.vmem %s2903_s10, %s2497_s16 }
  0x3a   : > { %s2549_s28 = scalar_lea.vmem [#allocation9], %s1967_s23  ;;  %p1980_p0 = scmp.ne.s32.totalorder %s2314_s21, 0 }
  0x3b   : > { %v688_v0 = vld [vmem:[%s642_s24] sm:$0xff] (!%p1980_p0)  ;;  %vm691_vm0 = vcmask (!%p1980_p0), 261120   ;;  %v2332_v5 = vmov (!%p1980_p0), 0   ;;  %s2957_s6 = sld [smem:[#allocation31_spill]] (!%p1980_p0)  ;;  %s2958_s23 = sld [smem:[#allocation32_spill]] (!%p1980_p0)  ;;  %vm731_vm1 = vcmask (!%p1980_p0), 257024  }
  0x3c   : > { %687 = sbr.rel (%p1980_p0) target bundleno = 381 (0x17d), region = 80  ;;  %v689_v1 = vld [vmem:[%s646_s19] sm:$0xff] (!%p1980_p0)  ;;  %2146 = vset.pattern.permute.xlu1 (!%p1980_p0), %v2332_v5  ;;  %2147 = vset.pattern.permute.xlu0 (!%p1980_p0), %v2332_v5 }
  0x3d   : > { %v690_v2 = vadd.f32 (!%p1980_p0), %v689_v1, %v688_v0  ;;  %v723_v4 = vld [vmem:[%s650_s14] sm:$0xff] (!%p1980_p0) }
  0x3e   : > { %726 = vperm.xlu1 (!%p1980_p0), %2146, %v723_v4  }
  0x3f   : > { %v693_v3 = vsel (!%p1980_p0), %vm691_vm0, %v690_v2, 0.0  ;;  %692 = vst.msk [vmem:[%s2551_s25] sm:$0xff] (!%p1980_p0), %vm691_vm0, %v690_v2 }
  0x40   : > { %694 = vadd.xlane.f32.xlu0 (!%p1980_p0), %v693_v3 }
  0x41   : > { %v1981_v15 = vld [vmem:[%s2957_s6] ss:$0 sm:$0xff] (!%p1980_p0) }
  0x42   : > { %v1982_v17 = vld [vmem:[%s2958_s23] ss:$0 sm:$0xff] (!%p1980_p0) }
  0xbd   : > { %v727_v19 = vpop.permute.xlu1 %726 }
  0xcd   : > { %v695_v6 = vpop.xlane.xlu0 %694 }
  0xce   : > { %v697_v7 = vmul.f32 0.03125, %v695_v6 }
  0xd0   : > { %v698_v8 = vsub.f32 %v690_v2, %v697_v7 }
  0xd2   : > { %v699_v9 = vmul.f32 %v698_v8, %v698_v8 }
  0xd4   : > { %v700_v10 = vsel %vm691_vm0, %v699_v9, 0.0 }
  0xd5   : > { %701 = vadd.xlane.f32.xlu0 %v700_v10 }
 0x162   : > { %v702_v11 = vpop.xlane.xlu0 %701 }
 0x163   : > { %v703_v12 = vmul.f32 0.03125, %v702_v11 }
 0x165   : > { %v704_v13 = vadd.f32 1e-05, %v703_v12 }
 0x167   : > { %2148 = vrsqrt.f32 %v704_v13 }
 0x171   : > { %v2149_v14 = vpop.eup %2148 }
 0x172   : > { %v706_v16 = vmul.f32 %v2149_v14, %v698_v8 }
 0x174   : > { %v714_v18 = vmul.f32 %v1981_v15, %v706_v16 }
 0x176   : > { %v722_v20 = vadd.f32 %v1982_v17, %v714_v18 }
 0x178   : > { %v729_v21 = vmul.f32 %v727_v19, %v722_v20 }
 0x17a   : > { %v730_v22 = vpack.c.bf16 %v729_v21, %v729_v21 }
 0x17c   : > { %732 = vst.msk [vmem:[#allocation2] sm:$0xf] %vm731_vm1, %v730_v22 }
 0x17d PF: > { %v2150_v23 = vld [vmem:[%s2512_s13] sm:$0xff]   ;;  %v2333_v24 = vmov 0.0   ;;  %v2151_v25 = vld [vmem:[%s2512_s13 + $0x8] sm:$0xff]   ;;  %vm2334_vm2 = vmmov 0   ;;  %vm750_vm3 = vcmask 261120   ;;  %vm794_vm4 = vcmask 518144   ;;  %s2959_s30 = scalar_lea.vmem %s2900_s7, %s2497_s16 }
 0x17e   : > { %2027 = vmatprep.subr.bf16.mxu1 %v2333_v24  ;;  %2047 = vmatprep.subr.mxu0 %v2333_v24  ;;  %795 = vst.msk [vmem:[#allocation3] sm:$0x7] %vm794_vm4, %v2333_v24  ;;  %v2152_v27 = vld [vmem:[%s2529_s17] sm:$0xff]   ;;  %v2153_v28 = vld [vmem:[%s2529_s17 + $0x8] sm:$0xff]   ;;  %v2154_v29 = vld [vmem:[%s2529_s17 + $0x10] sm:$0xff]   ;;  %v800_v31 = vlaneseq  ;;  %vm796_vm5 = vcmask 523264  }
 0x17f   : > { %2028 = vmatpush3.bf16.msra.mxu1 %v2150_v23  ;;  %2031 = vmatprep.mubr.msk.bf16.mxu1 %vm2334_vm2, %v2333_v24  ;;  %v2155_v30 = vld [vmem:[%s2529_s17 + $0x18] sm:$0xff]   ;;  %v798_v38 = vld [vmem:[%s2518_s29] sm:$0xf]  ;;  %vm929_vm6 = vcmask 1041408   ;;  %vm925_vm7 = vcmask 15360   ;;  %s2335_s29 = smov 126  }
 0x180   : > { %2029 = vmatprep.subr.bf16.mxu1 %v2333_v24  ;;  %2049 = vmatprep.mubr.msk.f32.mxu0 %vm2334_vm2, %v2333_v24  ;;  %v2584_v32 = vshrl.u32 %v800_v31, 7  ;;  %v1986_v56 = vld [vmem:[%s2959_s30] ss:$0 sm:$0xff]  ;;  %s2960_s3 = sld [smem:[#allocation35_spill]]  ;;  %vm1592_vm10 = vcmask 1041409   ;;  %vm1594_vm11 = vcmask 1042434  }
 0x181   : > { %v917_v2 = vld [vmem:[%s2534_s2] sm:$0x3]  ;;  %s2336_s2 = smov 64   ;;  %vm1596_vm12 = vcmask 1043459   ;;  %vm1598_vm13 = vcmask 1044484   ;;  %vm1600_vm14 = vcmask 1045509  }
 0x182   : > { %v2591_v35 = vsub.s32 0, %v2584_v32  ;;  %v809_v36 = vsub.s32 1, %v2584_v32  ;;  %v816_v40 = vsub.s32 2, %v2584_v32  ;;  %v823_v43 = vsub.s32 3, %v2584_v32  ;;  %2048 = vmatpush3.msk.msra.mxu0 %vm929_vm6, %v917_v2 }
 0x183   : > { %v733_v26 = vld [vmem:[#allocation2] sm:$0xf]  ;;  %2030 = vmatpush3.bf16.msra.mxu1 %v2151_v25  ;;  %2052 = vmatprep.subr.bf16.mxu0 %v2333_v24  ;;  %v1212_v13 = vsub.s32 4, %v2584_v32  ;;  %v1223_v15 = vsub.s32 5, %v2584_v32  ;;  %v1234_v17 = vsub.s32 6, %v2584_v32  ;;  %v1245_v19 = vsub.s32 7, %v2584_v32 }
 0x184   : > { %2035 = vmatprep.subr.bf16.mxu1 %v2333_v24  ;;  %v803_v41 = vrot.slane %v798_v38, %v2591_v35  ;;  %v810_v42 = vrot.slane %v798_v38, %v809_v36  ;;  %v817_v44 = vrot.slane %v798_v38, %v816_v40  ;;  %v824_v50 = vrot.slane %v798_v38, %v823_v43 }
 0x185   : > { %vm1602_vm15 = vcmask 1046534   ;;  %vm1604_vm0 = vcmask 1047559  }
 0x186   : > { %2032 = vmatmul.mubr.msk.bf16.vlgmr.msra.gmra.mrb[0].mxu1 %vm750_vm3, %v733_v26  ;;  %v2158_v38 = vld [vmem:[%s2960_s3 + $0x10] sm:$0xff]  }
 0x187   : > { %2043 = vmatprep.mubr.msk.bf16.mxu1 %vm2334_vm2, %v2333_v24  ;;  %2036 = vmatpush3.bf16.msra.mxu1 %v2152_v27 }
 0x188   : > { %2037 = vmatprep.subr.bf16.mxu1 %v2333_v24 }
 0x18b   : > { %2038 = vmatpush3.bf16.msra.mxu1 %v2153_v28  ;;  %v1992_v28 = vld [vmem:[%s674_s4] ss:$0 sm:$0xff] }
 0x18c   : > { %2039 = vmatprep.subr.bf16.mxu1 %v2333_v24 }
 0x18f   : > { %2040 = vmatpush3.bf16.msra.mxu1 %v2154_v29 }
 0x190   : > { %2041 = vmatprep.subr.bf16.mxu1 %v2333_v24 }
 0x193   : > { %2042 = vmatpush3.bf16.msra.mxu1 %v2155_v30 }
 0x259   : > { %v2586_v33 = vpop.f32.mrb[0].mxu1 }
 0x25a   : > { %797 = vst.msk [vmem:[#allocation3 + $0x3] sm:$0xff] %vm796_vm5, %v2586_v33  ;;  %v2033_v34 = vpop.f32.mrb[1].mxu1  ;;  %v1619_v20 = vsub.f32 0.0, %v2586_v33 }
 0x25b   : > { %v791_v37 = vpop.f32.mrb[2].mxu1 }
 0x25c   : > { %v2034_v39 = vpop.f32.mrb[3].mxu1  ;;  %v1620_v22 = vmul.f32 1.442695, %v1619_v20  ;;  %v2156_v37 = vld [vmem:[%s2960_s3] sm:$0xff]  }
 0x261   : > { %v799_v45 = vld [vmem:[#allocation3] sm:$0xff] }
 0x262   : > { %v806_v46 = vld [vmem:[#allocation3 + $0x1] sm:$0xff]  ;;  %v804_v48 = vmul.f32 %v803_v41, %v799_v45 }
 0x263   : > { %v813_v47 = vld [vmem:[#allocation3 + $0x2] sm:$0xff]  ;;  %v811_v49 = vmul.f32 %v810_v42, %v806_v46 }
 0x264   : > { %v820_v51 = vld [vmem:[#allocation3 + $0x3] sm:$0xff]  ;;  %v818_v53 = vmul.f32 %v817_v44, %v813_v47 }
 0x265   : > { %v812_v52 = vadd.f32 %v811_v49, %v804_v48  ;;  %v825_v55 = vmul.f32 %v824_v50, %v820_v51  ;;  %v2337_v50 = vmov 1966171168  }
 0x266   : > { %v1031_v51 = vunpack.c.l.s4 %v2337_v50 }
 0x267   : > { %v819_v54 = vadd.f32 %v818_v53, %v812_v52 }
 0x269   : > { %v826_v57 = vadd.f32 %v825_v55, %v819_v54  ;;  %v1032_v55 = vunpack.c.0.s8 %v1031_v51 }
 0x26b   : > { %v834_v58 = vadd.f32 %v1986_v56, %v826_v57 }
 0x26d   : > { %v835_v59 = vsub.f32 0.0, %v834_v58 }
 0x26f   : > { %v836_v60 = vmul.f32 1.442695, %v835_v59 }
 0x271   : > { %2160 = vpow2.f32 %v836_v60 }
 0x27b   : > { %v2161_v61 = vpop.eup %2160 }
 0x27c   : > { %v838_v62 = vadd.f32 1.0, %v2161_v61 }
 0x27e   : > { %2162 = vrcp.f32 %v838_v62 }
 0x27f   : > { %2164 = vpow2.f32 %v1620_v22 }
 0x288   : > { %v2163_v63 = vpop.eup %2162 }
 0x289   : > { %v840_v0 = vmul.f32 %v2163_v63, %v834_v58  ;;  %v2165_v23 = vpop.eup %2164  ;;  %v2651_v58 = vsub.s32 %v1032_v55, %v2584_v32  ;;  %v2669_v32 = vld [vmem:[%s2543_s0] sm:$0xff] }
 0x28a   : > { %v1622_v25 = vadd.f32 1.0, %v2165_v23 }
 0x28b   : > { %v841_v1 = vpack.c.bf16 %v840_v0, %v840_v0  ;;  %1018 = vst.msk [vmem:[#allocation5] sm:$0xff] %vm796_vm5, %v840_v0 }
 0x28c   : > { %2166 = vrcp.f32 %v1622_v25 }
 0x28d   : > { %2044 = vmatmul.mubr.msk.bf16.vlgmr.msra.gmra.mrb[4].mxu1 %vm796_vm5, %v841_v1 }
 0x296   : > { %v2167_v26 = vpop.eup %2166 }
 0x297   : > { %v1624_v27 = vmul.f32 %v2167_v26, %v2586_v33  ;;  %v2157_v33 = vld [vmem:[%s2960_s3 + $0x8] sm:$0xff]  }
 0x360   : > { %v911_v3 = vpop.f32.mrb[4].mxu1 }
 0x361   : > { %1019 = vrot.lane.b32.xlu0 %v911_v3, %s2335_s29  ;;  %v2045_v4 = vpop.f32.mrb[5].mxu1  ;;  %2050 = vmatmul.mubr.msk.f32.vlgmr.msra.gmra.mrb[0].mxu0 %vm925_vm7, %v911_v3 }
 0x362   : > { %v914_v5 = vpop.f32.mrb[6].mxu1  ;;  %2060 = vmatprep.mubr.msk.bf16.mxu0 %vm2334_vm2, %v2333_v24  ;;  %2053 = vmatpush3.bf16.msra.mxu0 %v2156_v37  ;;  %v2664_v4 = vld [vmem:[%s2543_s0 + $0x8] sm:$0xff] }
 0x363   : > { %v2046_v6 = vpop.f32.mrb[7].mxu1  ;;  %2054 = vmatprep.subr.bf16.mxu0 %v2333_v24  ;;  %v2666_v5 = vld [vmem:[#allocation5] sm:$0xff] }
 0x366   : > { %2055 = vmatpush3.bf16.msra.mxu0 %v2157_v33 }
 0x367   : > { %2056 = vmatprep.subr.bf16.mxu0 %v2333_v24 }
 0x36a   : > { %2057 = vmatpush3.bf16.msra.mxu0 %v2158_v38 }
 0x36b   : > { %2058 = vmatprep.subr.bf16.mxu0 %v2333_v24 }
 0x3d3   : > { %v1020_v7 = vpop.permute.xlu0 %1019 }
 0x3d4   : > { %1022 = vst.msk [vmem:[#allocation6] sm:$0xff] %vm750_vm3, %v1020_v7 }
 0x3db   : > { %v1027_v8 = vld [vmem:[#allocation6] sm:$0xff] }
 0x3dc   : > { %v1169_v9 = vrot.slane %v1027_v8, %v2591_v35  ;;  %v1180_v10 = vrot.slane %v1027_v8, %v809_v36  ;;  %v1191_v11 = vrot.slane %v1027_v8, %v816_v40  ;;  %v1202_v12 = vrot.slane %v1027_v8, %v823_v43  ;;  %v2159_v40 = vld [vmem:[%s2960_s3 + $0x18] sm:$0xff]  }
 0x3dd   : > { %v1213_v14 = vrot.slane %v1027_v8, %v1212_v13  ;;  %v1224_v16 = vrot.slane %v1027_v8, %v1223_v15  ;;  %v1235_v18 = vrot.slane %v1027_v8, %v1234_v17  ;;  %v1246_v21 = vrot.slane %v1027_v8, %v1245_v19  ;;  %2059 = vmatpush3.bf16.msra.mxu0 %v2159_v40 }
 0x3de   : > { %1175 = vbcast.lane.b32.xlu1 %v1169_v9, 264  ;;  %1171 = vbcast.lane.b32.xlu0 %v1169_v9, 256 }
 0x3e2   : > { %1182 = vbcast.lane.b32.xlu1 %v1180_v10, 256  ;;  %1186 = vbcast.lane.b32.xlu0 %v1180_v10, 264 }
 0x3e6   : > { %1193 = vbcast.lane.b32.xlu1 %v1191_v11, 256  ;;  %1197 = vbcast.lane.b32.xlu0 %v1191_v11, 264 }
 0x3ea   : > { %1204 = vbcast.lane.b32.xlu1 %v1202_v12, 256  ;;  %1208 = vbcast.lane.b32.xlu0 %v1202_v12, 264 }
 0x3ee   : > { %1215 = vbcast.lane.b32.xlu1 %v1213_v14, 256  ;;  %1219 = vbcast.lane.b32.xlu0 %v1213_v14, 264 }
 0x3f2   : > { %1226 = vbcast.lane.b32.xlu1 %v1224_v16, 256  ;;  %1230 = vbcast.lane.b32.xlu0 %v1224_v16, 264 }
 0x3f6   : > { %1237 = vbcast.lane.b32.xlu1 %v1235_v18, 256  ;;  %1241 = vbcast.lane.b32.xlu0 %v1235_v18, 264 }
 0x3fa   : > { %1248 = vbcast.lane.b32.xlu1 %v1246_v21, 256  ;;  %1252 = vbcast.lane.b32.xlu0 %v1246_v21, 264 }
 0x3fe   : > { %1418 = vbcast.lane.b32.xlu1 %v1169_v9, 272  ;;  %1422 = vbcast.lane.b32.xlu0 %v1169_v9, 280 }
 0x402   : > { %1426 = vbcast.lane.b32.xlu1 %v1180_v10, 272  ;;  %1430 = vbcast.lane.b32.xlu0 %v1180_v10, 280 }
 0x406   : > { %1434 = vbcast.lane.b32.xlu1 %v1191_v11, 272  ;;  %1438 = vbcast.lane.b32.xlu0 %v1191_v11, 280 }
 0x40a   : > { %1442 = vbcast.lane.b32.xlu1 %v1202_v12, 272  ;;  %1446 = vbcast.lane.b32.xlu0 %v1202_v12, 280 }
 0x40e   : > { %1450 = vbcast.lane.b32.xlu1 %v1213_v14, 272  ;;  %1454 = vbcast.lane.b32.xlu0 %v1213_v14, 280 }
 0x412   : > { %1458 = vbcast.lane.b32.xlu1 %v1224_v16, 272  ;;  %1462 = vbcast.lane.b32.xlu0 %v1224_v16, 280 }
 0x416   : > { %1466 = vbcast.lane.b32.xlu1 %v1235_v18, 272  ;;  %1470 = vbcast.lane.b32.xlu0 %v1235_v18, 280 }
 0x41a   : > { %1474 = vbcast.lane.b32.xlu1 %v1246_v21, 272  ;;  %1478 = vbcast.lane.b32.xlu0 %v1246_v21, 280 }
 0x41e   : > { %1626 = vrot.lane.b32.xlu1 %v1624_v27, %s2336_s2 }
 0x434   : > { %v999_v29 = vpop.f32.mrb[0].mxu0 }
 0x435   : > { %v1000_v30 = vadd.f32 %v1992_v28, %v999_v29  ;;  %v2051_v31 = vpop.f32.mrb[1].mxu0 }
 0x437   : > { %v1004_v34 = vmin.f32 %v1000_v30, 20.0  ;;  %vm1003_vm9 = vcmp.gt.f32.partialorder %v1000_v30, 20.0 }
 0x439   : > { %v1005_v36 = vmul.f32 1.442695, %v1004_v34 }
 0x43b   : > { %2168 = vpow2.f32 %v1005_v36 }
 0x445   : > { %v2169_v39 = vpop.eup %2168 }
 0x446   : > { %v1007_v41 = vadd.f32 1.0, %v2169_v39  ;;  %v1010_v42 = vmul.f32 -0.5, %v2169_v39  ;;  %v1013_v44 = vand.u32 2147483647, %v2169_v39 }
 0x448   : > { %2170 = vlog2.f32 %v1007_v41  ;;  %v1011_v43 = vadd.f32 1.0, %v1010_v42  ;;  %vm1014_vm8 = vcmp.lt.f32.partialorder %v1013_v44, 0.0004427343 }
 0x44a   : > { %v1012_v49 = vmul.f32 %v2169_v39, %v1011_v43 }
 0x450   : > { %v2637_v45 = vpop.permute.xlu1 %1175  ;;  %v2639_v46 = vpop.permute.xlu0 %1171 }
 0x452   : > { %v2171_v47 = vpop.eup %2170 }
 0x453   : > { %v1009_v48 = vmul.f32 0.6931472, %v2171_v47 }
 0x454   : > { %v2641_v52 = vpop.permute.xlu1 %1182  ;;  %v2643_v53 = vpop.permute.xlu0 %1186 }
 0x455   : > { %v1015_v24 = vsel %vm1014_vm8, %v1012_v49, %v1009_v48 }
 0x456   : > { %v1016_v54 = vsel %vm1003_vm9, %v1000_v30, %v1015_v24 }
 0x457   : > { %1017 = vst.msk [vmem:[#allocation4] sm:$0xff] %vm796_vm5, %v1016_v54 }
 0x458   : > { %v2646_v56 = vpop.permute.xlu1 %1193  ;;  %v2648_v57 = vpop.permute.xlu0 %1197 }
 0x45c   : > { %v2653_v59 = vpop.permute.xlu1 %1204  ;;  %v2655_v60 = vpop.permute.xlu0 %1208 }
 0x45e   : > { %v1025_v61 = vld [vmem:[#allocation4] sm:$0xff] }
 0x45f   : > { %v1036_v62 = vrot.slane %v1025_v61, %v2651_v58  ;;  %v1029_v3 = vcombine.high %v1025_v61, %v1025_v61  ;;  %v2673_v7 = vmul.f32 %v2666_v5, %v1025_v61 }
 0x460   : > { %v2658_v63 = vpop.permute.xlu1 %1215  ;;  %v2660_v0 = vpop.permute.xlu0 %1219 }
 0x461   : > { %v1052_v1 = vrot.slane %v1036_v62, %v2651_v58  ;;  %v1044_v2 = vcombine.high %v1036_v62, %v1036_v62  ;;  %v1043_v15 = vrot.slane %v1029_v3, %v2651_v58  ;;  %v1263_v19 = vrot.slane %v2673_v7, %v2651_v58 }
 0x463   : > { %v1081_v6 = vrot.slane %v1052_v1, %v2591_v35  ;;  %v1066_v8 = vrot.slane %v1044_v2, %v2651_v58  ;;  %v1074_v9 = vcombine.high %v1052_v1, %v1052_v1  ;;  %v1059_v29 = vrot.slane %v1043_v15, %v2651_v58 }
 0x464   : > { %v2676_v10 = vpop.permute.xlu1 %1226  ;;  %v2678_v11 = vpop.permute.xlu0 %1230  ;;  %v1045_v34 = vcombine.high %v1043_v15, %v1043_v15  ;;  %v1279_v36 = vrot.slane %v1263_v19, %v2651_v58  ;;  %v1271_v37 = vcombine.high %v1263_v19, %v1263_v19 }
 0x465   : > { %v1119_v12 = vmul.f32 %v1081_v6, %v2664_v4  ;;  %v1118_v13 = vmul.f32 %v1081_v6, %v2669_v32  ;;  %v1085_v14 = vrot.slane %v1066_v8, %v2591_v35  ;;  %v1089_v16 = vrot.slane %v1074_v9, %v2591_v35 }
 0x466   : > { %v1076_v17 = vcombine.high %v1066_v8, %v1066_v8  ;;  %v1097_v42 = vrot.slane %v1059_v29, %v2591_v35  ;;  %v1073_v44 = vrot.slane %v1045_v34, %v2651_v58  ;;  %v1308_v47 = vrot.slane %v1279_v36, %v2591_v35 }
 0x467   : > { %v1136_v18 = vmul.f32 1.442695, %v1119_v12  ;;  %v1134_v20 = vmul.f32 1.442695, %v1118_v13  ;;  %v1120_v21 = vmul.f32 %v1085_v14, %v2669_v32  ;;  %v1121_v22 = vmul.f32 %v1085_v14, %v2664_v4 }
 0x468   : > { %v1122_v23 = vmul.f32 %v1089_v16, %v2669_v32  ;;  %v2690_v25 = vpop.permute.xlu1 %1237  ;;  %v2692_v26 = vpop.permute.xlu0 %1241  ;;  %v1123_v27 = vmul.f32 %v1089_v16, %v2664_v4  ;;  %v1093_v28 = vrot.slane %v1076_v17, %v2591_v35  ;;  %v1293_v48 = vrot.slane %v1271_v37, %v2651_v58 }
 0x469   : > { %2172 = vpow2.f32 %v1136_v18  ;;  %v1138_v30 = vmul.f32 1.442695, %v1120_v21  ;;  %v1140_v31 = vmul.f32 1.442695, %v1121_v22  ;;  %v1127_v50 = vmul.f32 %v1097_v42, %v2664_v4 }
 0x46a   : > { %2174 = vpow2.f32 %v1134_v20  ;;  %v1142_v33 = vmul.f32 1.442695, %v1122_v23  ;;  %v1144_v40 = vmul.f32 1.442695, %v1123_v27  ;;  %v1125_v41 = vmul.f32 %v1093_v28, %v2664_v4 }
 0x46b   : > { %2176 = vpow2.f32 %v1140_v31  ;;  %v1124_v43 = vmul.f32 %v1093_v28, %v2669_v32  ;;  %v1126_v54 = vmul.f32 %v1097_v42, %v2669_v32  ;;  %v1101_v55 = vrot.slane %v1073_v44, %v2591_v35 }
 0x46c   : > { %v2698_v38 = vpop.permute.xlu1 %1248  ;;  %v2700_v39 = vpop.permute.xlu0 %1252  ;;  %2178 = vpow2.f32 %v1138_v30  ;;  %v1148_v49 = vmul.f32 1.442695, %v1125_v41  ;;  %v1075_v61 = vcombine.high %v1059_v29, %v1059_v29  ;;  %v1346_v2 = vmul.f32 %v1308_v47, %v2637_v45 }
 0x46d   : > { %2180 = vpow2.f32 %v1142_v33  ;;  %v1146_v24 = vmul.f32 1.442695, %v1124_v43  ;;  %v1312_v3 = vrot.slane %v1293_v48, %v2591_v35  ;;  %v1301_v6 = vcombine.high %v1279_v36, %v1279_v36 }
 0x46e   : > { %2182 = vpow2.f32 %v1144_v40  ;;  %v1256_v8 = vcombine.high %v2673_v7, %v2673_v7  ;;  %v1345_v13 = vmul.f32 %v1308_v47, %v2639_v46  ;;  %v1152_v14 = vmul.f32 1.442695, %v1127_v50 }
 0x46f   : > { %2184 = vpow2.f32 %v1148_v49  ;;  %v1129_v16 = vmul.f32 %v1101_v55, %v2664_v4  ;;  %v1105_v17 = vrot.slane %v1075_v61, %v2591_v35  ;;  %v1077_v18 = vcombine.high %v1073_v44, %v1073_v44 }
 0x470   : > { %v2709_v51 = vpop.permute.xlu0 %1422  ;;  %v2713_v62 = vpop.permute.xlu1 %1418  ;;  %2186 = vpow2.f32 %v1146_v24  ;;  %v1150_v45 = vmul.f32 1.442695, %v1126_v54  ;;  %v1128_v20 = vmul.f32 %v1101_v55, %v2669_v32  ;;  %v1347_v7 = vmul.f32 %v1312_v3, %v2641_v52 }
 0x471   : > { %v1316_v23 = vrot.slane %v1301_v6, %v2591_v35  ;;  %v1270_v46 = vrot.slane %v1256_v8, %v2651_v58  ;;  %v1348_v29 = vmul.f32 %v1312_v3, %v2643_v53  ;;  %v1303_v31 = vcombine.high %v1293_v48, %v1293_v48 }
 0x472   : > { %2188 = vpow2.f32 %v1152_v14  ;;  %v1156_v52 = vmul.f32 1.442695, %v1129_v16  ;;  %v1131_v37 = vmul.f32 %v1105_v17, %v2664_v4  ;;  %v1109_v33 = vrot.slane %v1077_v18, %v2591_v35 }
 0x473   : > { %v2173_v1 = vpop.eup %2172  ;;  %2190 = vpow2.f32 %v1150_v45  ;;  %v1154_v42 = vmul.f32 1.442695, %v1128_v20  ;;  %v1130_v43 = vmul.f32 %v1105_v17, %v2669_v32  ;;  %v2737_v47 = vrot.slane %v1270_v46, %v2651_v58 }
 0x474   : > { %v2175_v9 = vpop.eup %2174  ;;  %v1362_v12 = vmul.f32 0.0, %v2173_v1  ;;  %v2726_v27 = vpop.permute.xlu0 %1430  ;;  %v1272_v48 = vcombine.high %v1270_v46, %v1270_v46  ;;  %v1349_v49 = vmul.f32 %v1316_v23, %v2646_v56  ;;  %v1350_v50 = vmul.f32 %v1316_v23, %v2648_v57 }
 0x475   : > { %v1361_v15 = vmul.f32 0.0, %v2175_v9  ;;  %v2177_v21 = vpop.eup %2176  ;;  %v2730_v34 = vpop.permute.xlu1 %1426  ;;  %v1320_v54 = vrot.slane %v1303_v31, %v2591_v35  ;;  %2192 = vpow2.f32 %v1156_v52  ;;  %v1160_v61 = vmul.f32 1.442695, %v1131_v37 }
 0x476   : > { %v1364_v19 = vadd.f32 %v1362_v12, %v1346_v2  ;;  %v2179_v28 = vpop.eup %2178  ;;  %v1133_v1 = vmul.f32 %v1109_v33, %v2664_v4  ;;  %2194 = vpow2.f32 %v1154_v42  ;;  %v1158_v8 = vmul.f32 1.442695, %v1130_v43 }
 0x477   : > { %v1363_v22 = vadd.f32 %v1361_v15, %v1345_v13  ;;  %v2181_v40 = vpop.eup %2180  ;;  %v1132_v9 = vmul.f32 %v1109_v33, %v2669_v32  ;;  %v1324_v57 = vrot.slane %v2737_v47, %v2591_v35  ;;  %v1300_v13 = vrot.slane %v1272_v48, %v2651_v58 }
 0x478   : > { %1366 = vst.msk [vmem:[#allocation8 + $0x8] sm:$0xff] %vm796_vm5, %v1364_v19  ;;  %v1368_v30 = vmul.f32 %v2177_v21, %v1364_v19  ;;  %v2183_v53 = vpop.eup %2182  ;;  %v1439_v2 = vpop.permute.xlu0 %1438  ;;  %v1352_v15 = vmul.f32 %v1320_v54, %v2655_v60  ;;  %v1351_v16 = vmul.f32 %v1320_v54, %v2653_v59  ;;  %2196 = vpow2.f32 %v1160_v61 }
 0x479   : > { %1365 = vst.msk [vmem:[#allocation8] sm:$0xff] %vm796_vm5, %v1363_v22  ;;  %v1367_v36 = vmul.f32 %v2179_v28, %v1363_v22  ;;  %v2185_v3 = vpop.eup %2184  ;;  %v1435_v56 = vpop.permute.xlu1 %1434  ;;  %v1164_v32 = vmul.f32 1.442695, %v1133_v1  ;;  %2198 = vpow2.f32 %v1158_v8  ;;  %v1162_v21 = vmul.f32 1.442695, %v1132_v9 }
 0x47a   : > { %v1370_v41 = vadd.f32 %v1368_v30, %v1348_v29  ;;  %v2187_v14 = vpop.eup %2186  ;;  %v1353_v22 = vmul.f32 %v1324_v57, %v2658_v63  ;;  %v1302_v60 = vcombine.high %v2737_v47, %v2737_v47  ;;  %v1354_v28 = vmul.f32 %v1324_v57, %v2660_v0 }
 0x47b   : > { %v1369_v44 = vadd.f32 %v1367_v36, %v1347_v7  ;;  %v1328_v7 = vrot.slane %v1300_v13, %v2591_v35  ;;  %2200 = vpow2.f32 %v1164_v32 }
 0x47c   : > { %1373 = vst.msk [vmem:[#allocation8 + $0x18] sm:$0xff] %vm796_vm5, %v1370_v41  ;;  %v1375_v24 = vmul.f32 %v2183_v53, %v1370_v41  ;;  %v2189_v45 = vpop.eup %2188  ;;  %v1447_v46 = vpop.permute.xlu0 %1446  ;;  %2202 = vpow2.f32 %v1162_v21  ;;  %v1304_v41 = vcombine.high %v1300_v13, %v1300_v13 }
 0x47d   : > { %1372 = vst.msk [vmem:[#allocation8 + $0x10] sm:$0xff] %vm796_vm5, %v1369_v44  ;;  %v1374_v55 = vmul.f32 %v2181_v40, %v1369_v44  ;;  %v2191_v59 = vpop.eup %2190  ;;  %v1443_v52 = vpop.permute.xlu1 %1442  ;;  %v1355_v43 = vmul.f32 %v1328_v7, %v2676_v10 }
 0x47e   : > { %v1377_v6 = vadd.f32 %v1375_v24, %v1350_v50  ;;  %v1336_v61 = vrot.slane %v1304_v41, %v2591_v35 }
 0x47f   : > { %v1376_v12 = vadd.f32 %v1374_v55, %v1349_v49  ;;  %v1481_v19 = vld [vmem:[#allocation8 + $0x8] sm:$0xff]  ;;  %v2193_v42 = vpop.eup %2192 }
 0x480   : > { %1380 = vst.msk [vmem:[#allocation8 + $0x28] sm:$0xff] %vm796_vm5, %v1377_v6  ;;  %v1382_v4 = vmul.f32 %v2185_v3, %v1377_v6  ;;  %v1480_v18 = vld [vmem:[#allocation8] sm:$0xff]  ;;  %v1497_v31 = vmul.f32 %v1481_v19, %v2709_v51  ;;  %v1332_v51 = vrot.slane %v1302_v60, %v2591_v35  ;;  %v2195_v44 = vpop.eup %2194  ;;  %v1455_v54 = vpop.permute.xlu0 %1454 }
 0x481   : > { %1379 = vst.msk [vmem:[#allocation8 + $0x20] sm:$0xff] %vm796_vm5, %v1376_v12  ;;  %v1381_v17 = vmul.f32 %v2187_v14, %v1376_v12  ;;  %v1496_v30 = vmul.f32 %v1480_v18, %v2713_v62  ;;  %v1356_v62 = vmul.f32 %v1328_v7, %v2678_v11  ;;  %v1451_v3 = vpop.permute.xlu1 %1450 }
 0x482   : > { %v1384_v20 = vadd.f32 %v1382_v4, %v1352_v15  ;;  %v2197_v6 = vpop.eup %2196  ;;  %v1358_v9 = vmul.f32 %v1332_v51, %v2692_v26  ;;  %v1357_v35 = vmul.f32 %v1332_v51, %v2690_v25  ;;  %v1359_v26 = vmul.f32 %v1336_v61, %v2698_v38 }
 0x483   : > { %v1383_v58 = vadd.f32 %v1381_v17, %v1351_v16  ;;  %v1483_v23 = vld [vmem:[#allocation8 + $0x18] sm:$0xff]  ;;  %v2199_v57 = vpop.eup %2198 }
 0x484   : > { %1387 = vst.msk [vmem:[#allocation8 + $0x38] sm:$0xff] %vm796_vm5, %v1384_v20  ;;  %v1389_v29 = vmul.f32 %v2189_v45, %v1384_v20  ;;  %v1482_v36 = vld [vmem:[#allocation8 + $0x10] sm:$0xff]  ;;  %v1499_v33 = vmul.f32 %v1483_v23, %v2726_v27  ;;  %v1513_v27 = vsel %vm796_vm5, %v1497_v31, 0.0  ;;  %v1360_v20 = vmul.f32 %v1336_v61, %v2700_v39  ;;  %v1463_v7 = vpop.permute.xlu0 %1462 }
 0x485   : > { %1386 = vst.msk [vmem:[#allocation8 + $0x30] sm:$0xff] %vm796_vm5, %v1383_v58  ;;  %v1388_v63 = vmul.f32 %v2191_v59, %v1383_v58  ;;  %v1498_v37 = vmul.f32 %v1482_v36, %v2730_v34  ;;  %v1512_v34 = vsel %vm796_vm5, %v1496_v30, 0.0  ;;  %v2201_v19 = vpop.eup %2200 }
 0x486   : > { %v1391_v40 = vadd.f32 %v1389_v29, %v1354_v28  ;;  %v1522_v11 = vsel %vm796_vm5, %v1499_v33, 0.0  ;;  %v1514_v14 = vadd.f32 %v1513_v27, %v1512_v34  ;;  %v2203_v60 = vpop.eup %2202  ;;  %v1459_v29 = vpop.permute.xlu1 %1458 }
 0x487   : > { %v1390_v0 = vadd.f32 %v1388_v63, %v1353_v22  ;;  %v1485_v53 = vld [vmem:[#allocation8 + $0x28] sm:$0xff]  ;;  %v1521_v10 = vsel %vm796_vm5, %v1498_v37, 0.0 }
 0x488   : > { %1394 = vst.msk [vmem:[#allocation8 + $0x48] sm:$0xff] %vm796_vm5, %v1391_v40  ;;  %v1396_v47 = vmul.f32 %v2193_v42, %v1391_v40  ;;  %v1484_v48 = vld [vmem:[#allocation8 + $0x20] sm:$0xff]  ;;  %v1501_v49 = vmul.f32 %v1485_v53, %v1439_v2  ;;  %v1515_v23 = vrot.slane %v1514_v14, 4 }
 0x489   : > { %1393 = vst.msk [vmem:[#allocation8 + $0x40] sm:$0xff] %vm796_vm5, %v1390_v0  ;;  %v1395_v50 = vmul.f32 %v2195_v44, %v1390_v0  ;;  %v1500_v24 = vmul.f32 %v1484_v48, %v1435_v56  ;;  %v1523_v56 = vadd.f32 %v1522_v11, %v1521_v10  ;;  %v1471_v44 = vpop.permute.xlu0 %1470 }
 0x48a   : > { %v1398_v55 = vadd.f32 %v1396_v47, %v1356_v62  ;;  %v1531_v1 = vsel %vm796_vm5, %v1501_v49, 0.0  ;;  %v1516_v62 = vadd.f32 %v1515_v23, %v1514_v14  ;;  %v1467_v48 = vpop.permute.xlu1 %1466 }
 0x48b   : > { %v1397_v8 = vadd.f32 %v1395_v50, %v1355_v43  ;;  %v1530_v2 = vsel %vm796_vm5, %v1500_v24, 0.0  ;;  %v1487_v12 = vld [vmem:[#allocation8 + $0x38] sm:$0xff]  ;;  %v1524_v59 = vrot.slane %v1523_v56, 4 }
 0x48c   : > { %1401 = vst.msk [vmem:[#allocation8 + $0x58] sm:$0xff] %vm796_vm5, %v1398_v55  ;;  %v1403_v13 = vmul.f32 %v2197_v6, %v1398_v55  ;;  %v1532_v15 = vadd.f32 %v1531_v1, %v1530_v2  ;;  %v1486_v4 = vld [vmem:[#allocation8 + $0x30] sm:$0xff]  ;;  %v1503_v32 = vmul.f32 %v1487_v12, %v1447_v46  ;;  %v1517_v61 = vrot.slane %v1516_v62, 2 }
 0x48d   : > { %1400 = vst.msk [vmem:[#allocation8 + $0x50] sm:$0xff] %vm796_vm5, %v1397_v8  ;;  %v1402_v16 = vmul.f32 %v2199_v57, %v1397_v8  ;;  %v1502_v17 = vmul.f32 %v1486_v4, %v1443_v52  ;;  %v1525_v41 = vadd.f32 %v1524_v59, %v1523_v56  ;;  %v1479_v57 = vpop.permute.xlu0 %1478 }
 0x48e   : > { %v1405_v18 = vadd.f32 %v1403_v13, %v1358_v9  ;;  %v1540_v58 = vsel %vm796_vm5, %v1503_v32, 0.0  ;;  %v1533_v46 = vrot.slane %v1532_v15, 4  ;;  %v1475_v4 = vpop.permute.xlu1 %1474 }
 0x48f   : > { %v1404_v45 = vadd.f32 %v1402_v16, %v1357_v35  ;;  %v1539_v21 = vsel %vm796_vm5, %v1502_v17, 0.0  ;;  %v1489_v22 = vld [vmem:[#allocation8 + $0x48] sm:$0xff]  ;;  %v1526_v10 = vrot.slane %v1525_v41, 2  ;;  %v1518_v17 = vadd.f32 %v1517_v61, %v1516_v62 }
 0x490   : > { %1408 = vst.msk [vmem:[#allocation8 + $0x68] sm:$0xff] %vm796_vm5, %v1405_v18  ;;  %v1410_v25 = vmul.f32 %v2201_v19, %v1405_v18  ;;  %v1488_v28 = vld [vmem:[#allocation8 + $0x40] sm:$0xff]  ;;  %v1541_v30 = vadd.f32 %v1540_v58, %v1539_v21  ;;  %v1505_v31 = vmul.f32 %v1489_v22, %v1455_v54  ;;  %v1534_v51 = vadd.f32 %v1533_v46, %v1532_v15 }
 0x491   : > { %1407 = vst.msk [vmem:[#allocation8 + $0x60] sm:$0xff] %vm796_vm5, %v1404_v45  ;;  %v1409_v38 = vmul.f32 %v2203_v60, %v1404_v45  ;;  %v1504_v39 = vmul.f32 %v1488_v28, %v1451_v3  ;;  %v1527_v14 = vadd.f32 %v1526_v10, %v1525_v41  ;;  %v1519_v59 = vrot.slane %v1518_v17, 1 }
 0x492   : > { %v1412_v36 = vadd.f32 %v1410_v25, %v1360_v20  ;;  %v1542_v63 = vrot.slane %v1541_v30, 4  ;;  %v1549_v33 = vsel %vm796_vm5, %v1505_v31, 0.0  ;;  %v1535_v1 = vrot.slane %v1534_v51, 2 }
 0x493   : > { %v1411_v52 = vadd.f32 %v1409_v38, %v1359_v26  ;;  %v1548_v37 = vsel %vm796_vm5, %v1504_v39, 0.0  ;;  %v1491_v40 = vld [vmem:[#allocation8 + $0x58] sm:$0xff]  ;;  %v1528_v22 = vrot.slane %v1527_v14, 1 }
 0x494   : > { %1415 = vst.msk [vmem:[#allocation8 + $0x78] sm:$0xff] %vm796_vm5, %v1412_v36  ;;  %v1550_v42 = vadd.f32 %v1549_v33, %v1548_v37  ;;  %v1490_v0 = vld [vmem:[#allocation8 + $0x50] sm:$0xff]  ;;  %v1507_v43 = vmul.f32 %v1491_v40, %v1463_v7  ;;  %v1543_v47 = vadd.f32 %v1542_v63, %v1541_v30  ;;  %v1536_v32 = vadd.f32 %v1535_v1, %v1534_v51 }
 0x495   : > { %1414 = vst.msk [vmem:[#allocation8 + $0x70] sm:$0xff] %vm796_vm5, %v1411_v52  ;;  %v1506_v53 = vmul.f32 %v1490_v0, %v1459_v29  ;;  %v1529_v30 = vadd.f32 %v1528_v22, %v1527_v14  ;;  %v1520_v63 = vadd.f32 %v1519_v59, %v1518_v17 }
 0x496   : > { %v1551_v34 = vrot.slane %v1550_v42, 4  ;;  %v1558_v27 = vsel %vm796_vm5, %v1507_v43, 0.0  ;;  %v1544_v6 = vrot.slane %v1543_v47, 2  ;;  %v1537_v23 = vrot.slane %v1536_v32, 1 }
 0x497   : > { %v1557_v49 = vsel %vm796_vm5, %v1506_v53, 0.0  ;;  %v1493_v50 = vld [vmem:[#allocation8 + $0x68] sm:$0xff] }
 0x498   : > { %v1552_v11 = vadd.f32 %v1551_v34, %v1550_v42  ;;  %v1559_v24 = vadd.f32 %v1558_v27, %v1557_v49  ;;  %v1492_v54 = vld [vmem:[#allocation8 + $0x60] sm:$0xff]  ;;  %v1509_v55 = vmul.f32 %v1493_v50, %v1471_v44  ;;  %v1545_v26 = vadd.f32 %v1544_v6, %v1543_v47  ;;  %v1995_v50 = vld [vmem:[%s682_s15] ss:$0 sm:$0xff] }
 0x499   : > { %v1508_v3 = vmul.f32 %v1492_v54, %v1467_v48  ;;  %v1538_v52 = vadd.f32 %v1537_v23, %v1536_v32  ;;  %v1593_v42 = vsel %vm1592_vm10, %v1529_v30, %v1520_v63  ;;  %v1617_v10 = vmul.f32 %v1995_v50, %v2666_v5  ;;  %v1627_v54 = vpop.permute.xlu1 %1626 }
 0x49a   : > { %v1560_v8 = vrot.slane %v1559_v24, 4  ;;  %v1567_v9 = vsel %vm796_vm5, %v1509_v55, 0.0  ;;  %v1553_v2 = vrot.slane %v1552_v11, 2  ;;  %v1546_v46 = vrot.slane %v1545_v26, 1 }
 0x49b   : > { %v1566_v12 = vsel %vm796_vm5, %v1508_v3, 0.0  ;;  %v1495_v13 = vld [vmem:[#allocation8 + $0x78] sm:$0xff]  ;;  %v1595_v62 = vsel %vm1594_vm11, %v1538_v52, %v1593_v42 }
 0x49c   : > { %v1561_v56 = vadd.f32 %v1560_v8, %v1559_v24  ;;  %v1568_v15 = vadd.f32 %v1567_v9, %v1566_v12  ;;  %v1494_v35 = vld [vmem:[#allocation8 + $0x70] sm:$0xff]  ;;  %v1511_v16 = vmul.f32 %v1495_v13, %v1479_v57  ;;  %v1554_v21 = vadd.f32 %v1553_v2, %v1552_v11 }
 0x49d   : > { %v1510_v18 = vmul.f32 %v1494_v35, %v1475_v4  ;;  %v1547_v37 = vadd.f32 %v1546_v46, %v1545_v26 }
 0x49e   : > { %v1562_v19 = vrot.slane %v1561_v56, 2  ;;  %v1569_v45 = vrot.slane %v1568_v15, 4  ;;  %v1576_v20 = vsel %vm796_vm5, %v1511_v16, 0.0  ;;  %v1555_v38 = vrot.slane %v1554_v21, 1 }
 0x49f   : > { %v1575_v58 = vsel %vm796_vm5, %v1510_v18, 0.0  ;;  %v1597_v53 = vsel %vm1596_vm12, %v1547_v37, %v1595_v62 }
 0x4a0   : > { %v1563_v7 = vadd.f32 %v1562_v19, %v1561_v56  ;;  %v1570_v60 = vadd.f32 %v1569_v45, %v1568_v15  ;;  %v1577_v25 = vadd.f32 %v1576_v20, %v1575_v58  ;;  %v1556_v41 = vadd.f32 %v1555_v38, %v1554_v21 }
 0x4a2   : > { %v1571_v28 = vrot.slane %v1570_v60, 2  ;;  %v1578_v29 = vrot.slane %v1577_v25, 4  ;;  %v1564_v39 = vrot.slane %v1563_v7, 1  ;;  %v1599_v47 = vsel %vm1598_vm13, %v1556_v41, %v1597_v53 }
 0x4a4   : > { %v1572_v31 = vadd.f32 %v1571_v28, %v1570_v60  ;;  %v1579_v36 = vadd.f32 %v1578_v29, %v1577_v25  ;;  %v1565_v0 = vadd.f32 %v1564_v39, %v1563_v7 }
 0x4a6   : > { %v1573_v33 = vrot.slane %v1572_v31, 1  ;;  %v1580_v40 = vrot.slane %v1579_v36, 2  ;;  %v1601_v34 = vsel %vm1600_vm14, %v1565_v0, %v1599_v47 }
 0x4a8   : > { %v1581_v43 = vadd.f32 %v1580_v40, %v1579_v36  ;;  %v1574_v51 = vadd.f32 %v1573_v33, %v1572_v31 }
 0x4aa   : > { %v1582_v44 = vrot.slane %v1581_v43, 1  ;;  %v1603_v48 = vsel %vm1602_vm15, %v1574_v51, %v1601_v34 }
 0x4ac   : > { %v1583_v27 = vadd.f32 %v1582_v44, %v1581_v43 }
 0x4ae   : > { %v1605_v49 = vsel %vm1604_vm0, %v1583_v27, %v1603_v48 }
 0x4af   : > { %1607 = vst.msk [vmem:[#allocation7] sm:$0xff] %vm796_vm5, %v1605_v49 }
 0x4b6   : > { %v1608_v11 = vld [vmem:[#allocation7] sm:$0xff] }
 0x4b7   : > { %v1618_v24 = vadd.f32 %v1617_v10, %v1608_v11 }
 0x4b9   : > { %v1629_v55 = vmul.f32 %v1627_v54, %v1618_v24 }
 0x4bb   : > { %v1630_v61 = vpack.c.bf16 %v1629_v55, %v1629_v55 }
 0x4bd   : > { %2061 = vmatmul.mubr.msk.bf16.vlgmr.msra.gmra.mrb[4].mxu0 %vm796_vm5, %v1630_v61 }
 0x58d   : > { %1708 = sbr.rel (%p1980_p0) target bundleno = 1428 (0x594), region = 84 }
 0x590   : > { %v1700_v1 = vpop.f32.mrb[4].mxu0 }
 0x591   : > { %v2062_v3 = vpop.f32.mrb[5].mxu0  ;;  %1709 = vst.msk [vmem:[%s2549_s28] sm:$0xff] (!%p1980_p0), %vm750_vm3, %v1700_v1 }
 0x592   : > { %v1703_v6 = vpop.f32.mrb[6].mxu0 }
 0x593   : > { %v2063_v8 = vpop.f32.mrb[7].mxu0 }
 0x594 PF: > { %p2002_p1 = scmp.ne.s32.totalorder %s2314_s21, 1 }
 0x596   : > { %1713 = sbr.rel (%p2002_p1) target bundleno = 1437 (0x59d), region = 88 }
 0x598   : > { %v1714_v5 = vld [vmem:[%s2549_s28] sm:$0xff] (!%p2002_p1) }
 0x599   : > { %v1715_v9 = vadd.f32 (!%p2002_p1), %v1714_v5, %v1700_v1 }
 0x59b   : > { %1716 = vst.msk [vmem:[%s2549_s28] sm:$0xff] (!%p2002_p1), %vm750_vm3, %v1715_v9 }
 0x59d PF: > { %s2961_s16 = sld [smem:[#allocation18_spill]]  ;;  %s2962_s15 = sld [smem:[#allocation27_spill]] }
 0x59e   : > { %s2964_s30 = sld [smem:[#allocation36_spill]]  ;;  %s1736_s21 = sshll.u32 %s2549_s28, 4  ;;  %s1737_s21 = int_to_ptr.vmem [resolvable:$true] %s1736_s21 }
 0x59f   : > { %s2204_s20 = scalar_lea.vmem %s1737_s21, 128  ;;  %s2338_s17 = smov [#allocation9]  }
 0x5a0   : > { %p2205_p2 = scmp.ne.s32.totalorder %s1737_s21, %s2204_s20  ;;  %s2208_s22 = sshll.u32 %s2338_s17, 4  ;;  %s2209_s22 = int_to_ptr.vmem [resolvable:$false] %s2208_s22 }
 0x5a1   : > { %s2210_s27 = scalar_lea.vmem %s2209_s22, 256  ;;  %p2211_p6 = scmp.lt.s32.totalorder %s1737_s21, %s2209_s22 }
 0x5a2   : > { %p2206_p4 = pnand %p2205_p2, %p2469_p3  ;;  %p2212_p7 = scmp.lt.s32.totalorder %s2210_s27, %s2204_s20 }
 0x5a3   : > { %s2005_s23 = sshll.u32 %s2961_s16, 7  ;;  %s1718_s2 = scalar_lea.sflag [#allocation10], %s2962_s15 }
 0x5a4   : > { %s2818_s29 = scalar_lea.hbm %s2964_s30, %s2005_s23  ;;  %p2207_p5 = pneg %p2206_p4 }
 0x5a5   : > { %p2213_p8 = por %p2212_p7, %p2211_p6 }
 0x5a7   : > { %p2214_p10 = pnand %p2213_p8, %p2207_p5 }
 0x5a9   : > { %2217 = shalt.err (!%p2214_p10)
}
 0x5aa   : > { %s2218_s28 = scalar_lea.hbm %s2818_s29, 128  ;;  %s2222_s1 = scalar_lea.hbm %s2964_s30, 256 }
 0x5ab   : > { %p2219_p11 = scmp.ne.s32.totalorder %s2818_s29, %s2218_s28  ;;  %p2223_p0 = scmp.lt.u32.totalorder %s2818_s29, %s2964_s30 }
 0x5ac   : > { %p2224_p1 = scmp.lt.u32.totalorder %s2222_s1, %s2218_s28  ;;  %p2226_p4 = scmp.lt.u32.totalorder %s2218_s28, %s2818_s29 }
 0x5ad   : > { %p2220_p12 = pnand %p2219_p11, %p2469_p3 }
 0x5ae   : > { %p2225_p2 = por %p2224_p1, %p2223_p0 }
 0x5af   : > { %p2221_p13 = pneg %p2220_p12 }
 0x5b0   : > { %p2227_p5 = por %p2226_p4, %p2225_p2 }
 0x5b2   : > { %p2228_p6 = pnand %p2227_p5, %p2221_p13 }
 0x5b4   : > { %2231 = shalt.err (!%p2228_p6)
}
 0x5b5   : > { %2064 = dma.vmem_to_hbm [thread:$0]  (%p2469_p3), %s1737_s21, 128, %s2818_s29, %s1718_s2  }
 0x5b6   : > { %s2965_s14 = sld [smem:[#allocation37_spill]]  ;;  %s1749_s24 = sshll.u32 %s2551_s25, 4  ;;  %s1750_s24 = int_to_ptr.vmem [resolvable:$true] %s1749_s24 }
 0x5b7   : > { %s1723_s20 = scalar_lea.sflag [#allocation12], %s2962_s15  ;;  %s2232_s17 = scalar_lea.vmem %s1750_s24, 128 }
 0x5b8   : > { %p2233_p7 = scmp.ne.s32.totalorder %s1750_s24, %s2232_s17  ;;  %s2339_s22 = smov [#allocation11]  }
 0x5b9   : > { %s2236_s27 = sshll.u32 %s2339_s22, 4  ;;  %s2237_s27 = int_to_ptr.vmem [resolvable:$false] %s2236_s27 }
 0x5ba   : > { %p2234_p8 = pnand %p2233_p7, %p2469_p3  ;;  %s2238_s28 = scalar_lea.vmem %s2237_s27, 256 }
 0x5bb   : > { %p2239_p11 = scmp.lt.s32.totalorder %s1750_s24, %s2237_s27  ;;  %p2240_p12 = scmp.lt.s32.totalorder %s2238_s28, %s2232_s17 }
 0x5bc   : > { %s2844_s13 = scalar_lea.hbm %s2965_s14, %s2005_s23  ;;  %p2235_p10 = pneg %p2234_p8 }
 0x5bd   : > { %p2241_p13 = por %p2240_p12, %p2239_p11 }
 0x5bf   : > { %p2242_p0 = pnand %p2241_p13, %p2235_p10 }
 0x5c1   : > { %2245 = shalt.err (!%p2242_p0)
}
 0x5c2   : > { %s2246_s25 = scalar_lea.hbm %s2844_s13, 128  ;;  %s2250_s23 = scalar_lea.hbm %s2965_s14, 256 }
 0x5c3   : > { %p2247_p1 = scmp.ne.s32.totalorder %s2844_s13, %s2246_s25  ;;  %p2251_p5 = scmp.lt.u32.totalorder %s2844_s13, %s2965_s14 }
 0x5c4   : > { %p2252_p6 = scmp.lt.u32.totalorder %s2250_s23, %s2246_s25  ;;  %p2254_p8 = scmp.lt.u32.totalorder %s2246_s25, %s2844_s13 }
 0x5c5   : > { %p2248_p2 = pnand %p2247_p1, %p2469_p3 }
 0x5c6   : > { %p2253_p7 = por %p2252_p6, %p2251_p5 }
 0x5c7   : > { %p2249_p4 = pneg %p2248_p2 }
 0x5c8   : > { %p2255_p10 = por %p2254_p8, %p2253_p7 }
 0x5ca   : > { %p2256_p11 = pnand %p2255_p10, %p2249_p4 }
 0x5cc   : > { %2259 = shalt.err (!%p2256_p11)
}
 0x5cd   : > { %2065 = dma.vmem_to_hbm [thread:$0]  (%p2469_p3), %s1750_s24, 128, %s2844_s13, %s1723_s20  }
 0x5ce PF: > { %s2966_s2 = sld [smem:[#allocation21_spill]]  ;;  %s2967_s18 = sld [smem:[#allocation15_spill]] }
 0x5d4   : > { %p2075_p12 = scmp.ge.s32.totalorder %s2966_s2, 2  ;;  %s1761_s1 = sand.u32 1, %s2967_s18  }
 0x5d5   : > { %s1762_s4 = scalar_lea.sflag [#allocation10], %s1761_s1 }
 0x5d6   : > { %p2069_p13 = pnand %p2075_p12, %p2479_p9 }
 0x5d8   : > { %2293 = dma.done.wait (!%p2069_p13), %s1762_s4, 128  }
 0x5d9   : > { %2295 = vsyncadd (!%p2069_p13), %s1762_s4, 4294967168  ;;  %s1771_s5 = scalar_lea.sflag [#allocation12], %s1761_s1 }
 0x5da   : > { %2297 = dma.done.wait (!%p2069_p13), %s1771_s5, 128  }
 0x5db   : > { %2299 = vsyncadd (!%p2069_p13), %s1771_s5, 4294967168  ;;  %s32_s25 = sadd.s32 1, %s2966_s2   ;;  %s2969_s18 = sld [smem:[#allocation16_spill]] }
 0x5dc   : > { %p29_p0 = scmp.ge.s32.totalorder %s32_s25, 6   ;;  %s2970_s19 = sld [smem:[#allocation17_spill]] }
 0x5dd   : > { %s2971_s20 = sld [smem:[#allocation26_spill]]  ;;  %s2972_s21 = sld [smem:[#allocation19_spill]] }
 0x5de   : > { %s2973_s22 = sld [smem:[#allocation20_spill]]  ;;  %s2974_s23 = sld [smem:[#allocation22_spill]] }
 0x5df   : > { %s2975_s24 = sld [smem:[#allocation24_spill]]  ;;  %31 = sbr.rel (!%p29_p0) target bundleno = 18 (0x12), region = 177 }
 0x5e6   :  { %1776 = vsyncpa [#allocation10], 1 }
 0x5e7   :  { %1778 = vsyncpa [#allocation10 + $0x1], 1 }
 0x5e8   :  { %1779 = vsyncpa [#allocation12], 1 }
 0x5e9   :  { %1781 = vsyncpa [#allocation12 + $0x1], 1 }

</bundles_post_ra>
